<compile_context>
chip_gen: v5e
topology: v5e:2x2
jax: 0.10.0
libtpu: 0.0.40
codegen_flags: <defaults>
</compile_context>

<pallas_src>
import functools

import jax
import jax.numpy as jnp
from jax.experimental import pallas as pl
from jax.experimental.pallas import tpu as pltpu


# --------------------------------- helpers ---------------------------------- #

def _round_up(v, d):
    return -(-v // d) * d


def _padded_block_bytes(shape, dtype):
    """Physical VMEM bytes of one block: last dim -> 128 lanes, 2nd-last -> native sublanes."""
    item = jnp.dtype(dtype).itemsize
    dims = list(shape)
    if dims:
        dims[-1] = _round_up(dims[-1], 128)
    if len(dims) >= 2:
        dims[-2] = _round_up(dims[-2], 8 * max(1, 4 // item))
    total = item
    for d in dims:
        total *= d
    return total


# ------------------------------ Pallas kernels ------------------------------ #

def _conv_frame(w_ref, x_ref, *, kh, kw, wpp, tf):
    """Conv of one image as kh*kw tap matmuls.

    x_ref block: (1, Cin, L) row-flattened zero-padded image (row stride = wpp).
    w_ref block: (kh*kw, OC, Cin).
    Returns the f32 (OC, tf) output "frame", where frame column q = oh * wpp + ow
    (columns with ow >= OW are junk and are masked / sliced away by the caller).
    """
    xv = x_ref[0]                                           # (Cin, L)
    oc = w_ref.shape[1]
    acc = jnp.zeros((oc, tf), dtype=jnp.float32)
    for di in range(kh):
        for dj in range(kw):
            off = di * wpp + dj                             # static lane offset
            x_tap = xv[:, off:off + tf]                     # (Cin, tf)
            acc = acc + jnp.dot(w_ref[di * kw + dj], x_tap,
                                preferred_element_type=jnp.float32)
    return acc


def _conv_stats_kernel(w_ref, mask_ref, x_ref, sum_ref, sq_ref, *, kh, kw, wpp, tf):
    """Pass 1: per-image channel sum / sum-of-squares of the conv output (valid columns only)."""
    acc = _conv_frame(w_ref, x_ref, kh=kh, kw=kw, wpp=wpp, tf=tf)
    acc = acc * mask_ref[...]                               # zero out padded/junk columns
    sum_ref[0] = jnp.sum(acc, axis=1, keepdims=True)        # (OC, 1)
    sq_ref[0] = jnp.sum(acc * acc, axis=1, keepdims=True)   # mask in {0,1} so acc^2 is masked too


def _conv_bn_lrelu_kernel(w_ref, scale_ref, bias_ref, x_ref, o_ref, *,
                          kh, kw, wpp, tf, negative_slope):
    """Pass 2: recompute conv, apply fused BN affine + LeakyReLU, lane-dense (OC, tf) store."""
    acc = _conv_frame(w_ref, x_ref, kh=kh, kw=kw, wpp=wpp, tf=tf)
    y = acc * scale_ref[...] + bias_ref[...]                # (OC,1) broadcast over lanes
    o_ref[0] = jnp.where(y >= 0.0, y, negative_slope * y)


# ------------------------------ forward pass -------------------------------- #

def convolution_block_forward(x, weight, gamma, beta, *, stride, padding,
                              eps=1e-5, negative_slope=0.2,
                              compute_dtype=jnp.bfloat16):
    """x: (N, Cin, H, W) NCHW, weight: (OC, Cin, KH, KW). Returns (N, OC, OH, OW) f32."""
    n, cin, h, w = x.shape
    oc, cin_w, kh, kw = weight.shape
    assert cin == cin_w
    if stride != 1:
        # TODO(synk): general stride needs strided tap windows (pl.ds(..., stride=s)) or a
        # polyphase decomposition; the module under test uses stride=1.
        raise NotImplementedError("tap-window conv kernel currently supports stride=1 only")

    oh = (h + 2 * padding - kh) // stride + 1
    ow = (w + 2 * padding - kw) // stride + 1
    hp = h + 2 * padding
    wp = w + 2 * padding
    wpp = _round_up(wp, 8)              # padded row pitch (=> frame of 16*24=384 lanes here)
    f = oh * wpp                        # output-frame columns per image
    flat_len = (hp + 1) * wpp           # +1 zero row so every tap window stays in bounds
    khkw = kh * kw

    # --- layout prep (single cheap pass over x; no kh*kw-inflated im2col matrix) ---
    x_padded = jnp.pad(
        x, ((0, 0), (0, 0), (padding, padding + 1), (padding, wpp - w - padding)))
    x_flat = x_padded.reshape(n, cin, flat_len).astype(compute_dtype)      # (N, Cin, L)
    # w_taps[di*kw+dj, o, c] == weight[o, c, di, dj]
    w_taps = weight.transpose(2, 3, 0, 1).reshape(khkw, oc, cin).astype(compute_dtype)
    # valid-column mask for the frame (frame col q valid iff q % wpp < OW)
    mask = (jnp.arange(f, dtype=jnp.int32) % wpp < ow).astype(jnp.float32).reshape(1, f)

    # --- padded-shape-aware VMEM budget (double-buffered blocks), capped v7x-safe ---
    blocks = [((khkw, oc, cin), compute_dtype), ((1, f), jnp.float32),
              ((oc, 1), jnp.float32), ((oc, 1), jnp.float32),
              ((1, cin, flat_len), compute_dtype), ((1, oc, f), jnp.float32),
              ((1, oc, 1), jnp.float32), ((1, oc, 1), jnp.float32)]
    est = 2 * sum(_padded_block_bytes(s, d) for s, d in blocks)
    vmem_limit = int(min(max(4 * est, 32 << 20), 48 << 20))

    # --- pass 1: conv + per-image partial batch statistics (no conv intermediate written) ---
    # TODO(synk): for large feature maps, add an intra-image row-tile grid axis with manual
    # halo DMA instead of one whole-image frame per grid step.
    ch_sum, ch_sq = pl.pallas_call(
        functools.partial(_conv_stats_kernel, kh=kh, kw=kw, wpp=wpp, tf=f),
        out_shape=(jax.ShapeDtypeStruct((n, oc, 1), jnp.float32),
                   jax.ShapeDtypeStruct((n, oc, 1), jnp.float32)),
        grid_spec=pltpu.PrefetchScalarGridSpec(
            num_scalar_prefetch=0,
            grid=(n,),
            in_specs=[
                pl.BlockSpec((khkw, oc, cin), lambda i: (0, 0, 0)),
                pl.BlockSpec((1, f), lambda i: (0, 0)),
                pl.BlockSpec((1, cin, flat_len), lambda i: (i, 0, 0)),
            ],
            out_specs=(pl.BlockSpec((1, oc, 1), lambda i: (i, 0, 0)),
                       pl.BlockSpec((1, oc, 1), lambda i: (i, 0, 0))),
        ),
        compiler_params=pltpu.CompilerParams(
            dimension_semantics=("parallel",),
            vmem_limit_bytes=vmem_limit,
        ),
    )(w_taps, mask, x_flat)

    # --- tiny per-channel glue: BN scale/bias from batch statistics ---
    count = float(n * oh * ow)
    total_sum = jnp.sum(ch_sum, axis=(0, 2))                 # (OC,)
    total_sq = jnp.sum(ch_sq, axis=(0, 2))                   # (OC,)
    mean = total_sum / count
    # E[x^2] - mean^2 can cancel badly when |mean| >> std; fine for conv activations here.
    var = total_sq / count - mean * mean                     # biased var (PyTorch BN training norm)
    inv_std = jax.lax.rsqrt(var + eps)
    scale = (gamma * inv_std).astype(jnp.float32).reshape(oc, 1)
    bias = (beta - mean * gamma * inv_std).astype(jnp.float32).reshape(oc, 1)
    # TODO(synk): running_mean / running_var buffer updates of nn.BatchNorm2d are not produced
    # (forward-only, batch-stat normalization as in train mode).

    # --- pass 2: recompute conv + fused BN affine + LeakyReLU, lane-dense (OC, frame) output ---
    out_frame = pl.pallas_call(
        functools.partial(_conv_bn_lrelu_kernel, kh=kh, kw=kw, wpp=wpp, tf=f,
                          negative_slope=negative_slope),
        out_shape=jax.ShapeDtypeStruct((n, oc, f), jnp.float32),
        grid_spec=pltpu.PrefetchScalarGridSpec(
            num_scalar_prefetch=0,
            grid=(n,),
            in_specs=[
                pl.BlockSpec((khkw, oc, cin), lambda i: (0, 0, 0)),
                pl.BlockSpec((oc, 1), lambda i: (0, 0)),
                pl.BlockSpec((oc, 1), lambda i: (0, 0)),
                pl.BlockSpec((1, cin, flat_len), lambda i: (i, 0, 0)),
            ],
            out_specs=pl.BlockSpec((1, oc, f), lambda i: (i, 0, 0)),
        ),
        compiler_params=pltpu.CompilerParams(
            dimension_semantics=("parallel",),
            vmem_limit_bytes=vmem_limit,
        ),
    )(w_taps, scale, bias, x_flat)

    # Frame -> NCHW: pure reshape + a contiguous minor-dim prefix slice, no transpose needed.
    return out_frame.reshape(n, oc, oh, wpp)[:, :, :, :ow]


# -------------------------------- reference --------------------------------- #

def _reference(x, weight, gamma, beta, *, stride, padding, eps=1e-5, slope=0.2):
    conv = jax.lax.conv_general_dilated(
        x, weight, window_strides=(stride, stride),
        padding=[(padding, padding), (padding, padding)],
        dimension_numbers=("NCHW", "OIHW", "NCHW"),
        precision=jax.lax.Precision.HIGHEST)
    mean = conv.mean(axis=(0, 2, 3), keepdims=True)
    var = conv.var(axis=(0, 2, 3), keepdims=True)
    y = (conv - mean) / jnp.sqrt(var + eps)
    y = y * gamma.reshape(1, -1, 1, 1) + beta.reshape(1, -1, 1, 1)
    return jnp.where(y >= 0, y, slope * y)


# ----------------------------------- main ------------------------------------ #

if __name__ == "__main__":
    # ConvolutionBlock(in_channel=4, out_channels=8, kernel_size=3, stride=1, padding=1)
    in_channel, out_channels, kernel_size, stride, padding = 4, 8, 3, 1, 1
    N, H, W = 2, 16, 16

    key = jax.random.PRNGKey(0)
    kx, kw_, kg, kb = jax.random.split(key, 4)
    x = jax.random.normal(kx, (N, in_channel, H, W), dtype=jnp.float32)
    weight = 0.1 * jax.random.normal(
        kw_, (out_channels, in_channel, kernel_size, kernel_size), dtype=jnp.float32)
    gamma = 1.0 + 0.1 * jax.random.normal(kg, (out_channels,), dtype=jnp.float32)
    beta = 0.1 * jax.random.normal(kb, (out_channels,), dtype=jnp.float32)

    fwd = jax.jit(functools.partial(convolution_block_forward,
                                    stride=stride, padding=padding))
    out = jax.block_until_ready(fwd(x, weight, gamma, beta))

    ref = _reference(x, weight, gamma, beta, stride=stride, padding=padding)
    assert out.shape == ref.shape == (N, out_channels, H, W)
    # Tolerance accounts for bf16 matmul operands (f32 accumulation); the BN 1/std
    # amplifies operand-rounding error somewhat.
    err = float(jnp.max(jnp.abs(out - ref)))
    assert err < 5e-2, f"mismatch vs reference: {err}"
    print("KERNEL_OK")
</pallas_src>

<mosaic_0001>
module attributes {stable_mosaic.version = 11 : i64} {
  func.func @_conv_stats_kernel(%arg0: i32, %arg1: memref<9x8x4xbf16, #tpu.memory_space<vmem>>, %arg2: memref<1x384xf32, #tpu.memory_space<vmem>>, %arg3: memref<1x4x456xbf16, #tpu.memory_space<vmem>>, %arg4: memref<1x8x1xf32, #tpu.memory_space<vmem>>, %arg5: memref<1x8x1xf32, #tpu.memory_space<vmem>>) attributes {dimension_semantics = [#tpu.dimension_semantics<parallel>], iteration_bounds = array<i64: 2>, scalar_prefetch = 0 : i64, scratch_operands = 0 : i64, tpu.core_type = #tpu.core_type<tc>, window_params = [{pipeline_mode = #tpu.pipeline_mode<synchronous>, transform_indices = @transform_0, window_bounds = array<i64: 9, 8, 4>}, {pipeline_mode = #tpu.pipeline_mode<synchronous>, transform_indices = @transform_1, window_bounds = array<i64: 1, 384>}, {transform_indices = @transform_2, window_bounds = array<i64: 1, 4, 456>}, {transform_indices = @transform_3, window_bounds = array<i64: 1, 8, 1>}, {transform_indices = @transform_4, window_bounds = array<i64: 1, 8, 1>}]} {
    %c0 = arith.constant 0 : index
    %c0_0 = arith.constant 0 : index
    %c0_1 = arith.constant 0 : index
    %0 = vector.load %arg3[%c0, %c0_0, %c0_1] : memref<1x4x456xbf16, #tpu.memory_space<vmem>>, vector<1x4x456xbf16>
    %1 = vector.shape_cast %0 : vector<1x4x456xbf16> to vector<4x456xbf16>
    %cst = arith.constant 0.000000e+00 : f32
    %2 = vector.broadcast %cst : f32 to vector<8x384xf32>
    %3 = vector.extract_strided_slice %1 {offsets = [0, 0], sizes = [4, 384], strides = [1, 1]} : vector<4x456xbf16> to vector<4x384xbf16>
    %c0_2 = arith.constant 0 : index
    %c0_3 = arith.constant 0 : index
    %c0_4 = arith.constant 0 : index
    %4 = vector.load %arg1[%c0_2, %c0_3, %c0_4] : memref<9x8x4xbf16, #tpu.memory_space<vmem>>, vector<1x8x4xbf16>
    %5 = vector.shape_cast %4 : vector<1x8x4xbf16> to vector<8x4xbf16>
    %cst_5 = arith.constant dense<0.000000e+00> : vector<8x384xf32>
    %6 = tpu.matmul %5, %3, %cst_5 {dimension_numbers = #tpu.dot_dimension_numbers<[1], [0], [0], [1], [0, 0, 1, 1], [], []>} : vector<8x4xbf16>, vector<4x384xbf16>, vector<8x384xf32> -> vector<8x384xf32>
    %7 = arith.addf %2, %6 : vector<8x384xf32>
    %8 = vector.extract_strided_slice %1 {offsets = [0, 1], sizes = [4, 384], strides = [1, 1]} : vector<4x456xbf16> to vector<4x384xbf16>
    %c1 = arith.constant 1 : index
    %c0_6 = arith.constant 0 : index
    %c0_7 = arith.constant 0 : index
    %9 = vector.load %arg1[%c1, %c0_6, %c0_7] : memref<9x8x4xbf16, #tpu.memory_space<vmem>>, vector<1x8x4xbf16>
    %10 = vector.shape_cast %9 : vector<1x8x4xbf16> to vector<8x4xbf16>
    %cst_8 = arith.constant dense<0.000000e+00> : vector<8x384xf32>
    %11 = tpu.matmul %10, %8, %cst_8 {dimension_numbers = #tpu.dot_dimension_numbers<[1], [0], [0], [1], [0, 0, 1, 1], [], []>} : vector<8x4xbf16>, vector<4x384xbf16>, vector<8x384xf32> -> vector<8x384xf32>
    %12 = arith.addf %7, %11 : vector<8x384xf32>
    %13 = vector.extract_strided_slice %1 {offsets = [0, 2], sizes = [4, 384], strides = [1, 1]} : vector<4x456xbf16> to vector<4x384xbf16>
    %c2 = arith.constant 2 : index
    %c0_9 = arith.constant 0 : index
    %c0_10 = arith.constant 0 : index
    %14 = vector.load %arg1[%c2, %c0_9, %c0_10] : memref<9x8x4xbf16, #tpu.memory_space<vmem>>, vector<1x8x4xbf16>
    %15 = vector.shape_cast %14 : vector<1x8x4xbf16> to vector<8x4xbf16>
    %cst_11 = arith.constant dense<0.000000e+00> : vector<8x384xf32>
    %16 = tpu.matmul %15, %13, %cst_11 {dimension_numbers = #tpu.dot_dimension_numbers<[1], [0], [0], [1], [0, 0, 1, 1], [], []>} : vector<8x4xbf16>, vector<4x384xbf16>, vector<8x384xf32> -> vector<8x384xf32>
    %17 = arith.addf %12, %16 : vector<8x384xf32>
    %18 = vector.extract_strided_slice %1 {offsets = [0, 24], sizes = [4, 384], strides = [1, 1]} : vector<4x456xbf16> to vector<4x384xbf16>
    %c3 = arith.constant 3 : index
    %c0_12 = arith.constant 0 : index
    %c0_13 = arith.constant 0 : index
    %19 = vector.load %arg1[%c3, %c0_12, %c0_13] : memref<9x8x4xbf16, #tpu.memory_space<vmem>>, vector<1x8x4xbf16>
    %20 = vector.shape_cast %19 : vector<1x8x4xbf16> to vector<8x4xbf16>
    %cst_14 = arith.constant dense<0.000000e+00> : vector<8x384xf32>
    %21 = tpu.matmul %20, %18, %cst_14 {dimension_numbers = #tpu.dot_dimension_numbers<[1], [0], [0], [1], [0, 0, 1, 1], [], []>} : vector<8x4xbf16>, vector<4x384xbf16>, vector<8x384xf32> -> vector<8x384xf32>
    %22 = arith.addf %17, %21 : vector<8x384xf32>
    %23 = vector.extract_strided_slice %1 {offsets = [0, 25], sizes = [4, 384], strides = [1, 1]} : vector<4x456xbf16> to vector<4x384xbf16>
    %c4 = arith.constant 4 : index
    %c0_15 = arith.constant 0 : index
    %c0_16 = arith.constant 0 : index
    %24 = vector.load %arg1[%c4, %c0_15, %c0_16] : memref<9x8x4xbf16, #tpu.memory_space<vmem>>, vector<1x8x4xbf16>
    %25 = vector.shape_cast %24 : vector<1x8x4xbf16> to vector<8x4xbf16>
    %cst_17 = arith.constant dense<0.000000e+00> : vector<8x384xf32>
    %26 = tpu.matmul %25, %23, %cst_17 {dimension_numbers = #tpu.dot_dimension_numbers<[1], [0], [0], [1], [0, 0, 1, 1], [], []>} : vector<8x4xbf16>, vector<4x384xbf16>, vector<8x384xf32> -> vector<8x384xf32>
    %27 = arith.addf %22, %26 : vector<8x384xf32>
    %28 = vector.extract_strided_slice %1 {offsets = [0, 26], sizes = [4, 384], strides = [1, 1]} : vector<4x456xbf16> to vector<4x384xbf16>
    %c5 = arith.constant 5 : index
    %c0_18 = arith.constant 0 : index
    %c0_19 = arith.constant 0 : index
    %29 = vector.load %arg1[%c5, %c0_18, %c0_19] : memref<9x8x4xbf16, #tpu.memory_space<vmem>>, vector<1x8x4xbf16>
    %30 = vector.shape_cast %29 : vector<1x8x4xbf16> to vector<8x4xbf16>
    %cst_20 = arith.constant dense<0.000000e+00> : vector<8x384xf32>
    %31 = tpu.matmul %30, %28, %cst_20 {dimension_numbers = #tpu.dot_dimension_numbers<[1], [0], [0], [1], [0, 0, 1, 1], [], []>} : vector<8x4xbf16>, vector<4x384xbf16>, vector<8x384xf32> -> vector<8x384xf32>
    %32 = arith.addf %27, %31 : vector<8x384xf32>
    %33 = vector.extract_strided_slice %1 {offsets = [0, 48], sizes = [4, 384], strides = [1, 1]} : vector<4x456xbf16> to vector<4x384xbf16>
    %c6 = arith.constant 6 : index
    %c0_21 = arith.constant 0 : index
    %c0_22 = arith.constant 0 : index
    %34 = vector.load %arg1[%c6, %c0_21, %c0_22] : memref<9x8x4xbf16, #tpu.memory_space<vmem>>, vector<1x8x4xbf16>
    %35 = vector.shape_cast %34 : vector<1x8x4xbf16> to vector<8x4xbf16>
    %cst_23 = arith.constant dense<0.000000e+00> : vector<8x384xf32>
    %36 = tpu.matmul %35, %33, %cst_23 {dimension_numbers = #tpu.dot_dimension_numbers<[1], [0], [0], [1], [0, 0, 1, 1], [], []>} : vector<8x4xbf16>, vector<4x384xbf16>, vector<8x384xf32> -> vector<8x384xf32>
    %37 = arith.addf %32, %36 : vector<8x384xf32>
    %38 = vector.extract_strided_slice %1 {offsets = [0, 49], sizes = [4, 384], strides = [1, 1]} : vector<4x456xbf16> to vector<4x384xbf16>
    %c7 = arith.constant 7 : index
    %c0_24 = arith.constant 0 : index
    %c0_25 = arith.constant 0 : index
    %39 = vector.load %arg1[%c7, %c0_24, %c0_25] : memref<9x8x4xbf16, #tpu.memory_space<vmem>>, vector<1x8x4xbf16>
    %40 = vector.shape_cast %39 : vector<1x8x4xbf16> to vector<8x4xbf16>
    %cst_26 = arith.constant dense<0.000000e+00> : vector<8x384xf32>
    %41 = tpu.matmul %40, %38, %cst_26 {dimension_numbers = #tpu.dot_dimension_numbers<[1], [0], [0], [1], [0, 0, 1, 1], [], []>} : vector<8x4xbf16>, vector<4x384xbf16>, vector<8x384xf32> -> vector<8x384xf32>
    %42 = arith.addf %37, %41 : vector<8x384xf32>
    %43 = vector.extract_strided_slice %1 {offsets = [0, 50], sizes = [4, 384], strides = [1, 1]} : vector<4x456xbf16> to vector<4x384xbf16>
    %c8 = arith.constant 8 : index
    %c0_27 = arith.constant 0 : index
    %c0_28 = arith.constant 0 : index
    %44 = vector.load %arg1[%c8, %c0_27, %c0_28] : memref<9x8x4xbf16, #tpu.memory_space<vmem>>, vector<1x8x4xbf16>
    %45 = vector.shape_cast %44 : vector<1x8x4xbf16> to vector<8x4xbf16>
    %cst_29 = arith.constant dense<0.000000e+00> : vector<8x384xf32>
    %46 = tpu.matmul %45, %43, %cst_29 {dimension_numbers = #tpu.dot_dimension_numbers<[1], [0], [0], [1], [0, 0, 1, 1], [], []>} : vector<8x4xbf16>, vector<4x384xbf16>, vector<8x384xf32> -> vector<8x384xf32>
    %47 = arith.addf %42, %46 : vector<8x384xf32>
    %c0_30 = arith.constant 0 : index
    %c0_31 = arith.constant 0 : index
    %48 = vector.load %arg2[%c0_30, %c0_31] : memref<1x384xf32, #tpu.memory_space<vmem>>, vector<1x384xf32>
    %49 = vector.broadcast %48 : vector<1x384xf32> to vector<8x384xf32>
    %50 = arith.mulf %47, %49 : vector<8x384xf32>
    %cst_32 = arith.constant dense<0.000000e+00> : vector<8xf32>
    %51 = vector.multi_reduction <add>, %50, %cst_32 [1] : vector<8x384xf32> to vector<8xf32>
    %52 = vector.shape_cast %51 : vector<8xf32> to vector<8x1xf32>
    %c0_33 = arith.constant 0 : index
    %c0_34 = arith.constant 0 : index
    %c0_35 = arith.constant 0 : index
    %53 = vector.load %arg4[%c0_33, %c0_34, %c0_35] : memref<1x8x1xf32, #tpu.memory_space<vmem>>, vector<1x8x1xf32>
    %54 = vector.shape_cast %53 : vector<1x8x1xf32> to vector<8x1xf32>
    %55 = vector.shape_cast %52 : vector<8x1xf32> to vector<1x8x1xf32>
    tpu.vector_store %arg4[%c0_33, %c0_34, %c0_35], %55 {strides = array<i32>} : memref<1x8x1xf32, #tpu.memory_space<vmem>>, vector<1x8x1xf32>,
    %56 = arith.mulf %50, %50 : vector<8x384xf32>
    %cst_36 = arith.constant dense<0.000000e+00> : vector<8xf32>
    %57 = vector.multi_reduction <add>, %56, %cst_36 [1] : vector<8x384xf32> to vector<8xf32>
    %58 = vector.shape_cast %57 : vector<8xf32> to vector<8x1xf32>
    %c0_37 = arith.constant 0 : index
    %c0_38 = arith.constant 0 : index
    %c0_39 = arith.constant 0 : index
    %59 = vector.load %arg5[%c0_37, %c0_38, %c0_39] : memref<1x8x1xf32, #tpu.memory_space<vmem>>, vector<1x8x1xf32>
    %60 = vector.shape_cast %59 : vector<1x8x1xf32> to vector<8x1xf32>
    %61 = vector.shape_cast %58 : vector<8x1xf32> to vector<1x8x1xf32>
    tpu.vector_store %arg5[%c0_37, %c0_38, %c0_39], %61 {strides = array<i32>} : memref<1x8x1xf32, #tpu.memory_space<vmem>>, vector<1x8x1xf32>,
    return
  }
  func.func @transform_0(%arg0: i32) -> (i32, i32, i32) {
    %c0_i32 = arith.constant 0 : i32
    %c0_i32_0 = arith.constant 0 : i32
    %c0_i32_1 = arith.constant 0 : i32
    %c0_i32_2 = arith.constant 0 : i32
    return %c0_i32, %c0_i32_0, %c0_i32_1 : i32, i32, i32
  }
  func.func @transform_1(%arg0: i32) -> (i32, i32) {
    %c0_i32 = arith.constant 0 : i32
    %c0_i32_0 = arith.constant 0 : i32
    %c0_i32_1 = arith.constant 0 : i32
    return %c0_i32, %c0_i32_0 : i32, i32
  }
  func.func @transform_2(%arg0: i32) -> (i32, i32, i32) {
    %c0_i32 = arith.constant 0 : i32
    %c0_i32_0 = arith.constant 0 : i32
    %c0_i32_1 = arith.constant 0 : i32
    return %arg0, %c0_i32, %c0_i32_0 : i32, i32, i32
  }
  func.func @transform_3(%arg0: i32) -> (i32, i32, i32) {
    %c0_i32 = arith.constant 0 : i32
    %c0_i32_0 = arith.constant 0 : i32
    %c0_i32_1 = arith.constant 0 : i32
    return %arg0, %c0_i32, %c0_i32_0 : i32, i32, i32
  }
  func.func @transform_4(%arg0: i32) -> (i32, i32, i32) {
    %c0_i32 = arith.constant 0 : i32
    %c0_i32_0 = arith.constant 0 : i32
    %c0_i32_1 = arith.constant 0 : i32
    return %arg0, %c0_i32, %c0_i32_0 : i32, i32, i32
  }
}

module attributes {stable_mosaic.version = 11 : i64} {
  func.func @_conv_bn_lrelu_kernel(%arg0: i32, %arg1: memref<9x8x4xbf16, #tpu.memory_space<vmem>>, %arg2: memref<8x1xf32, #tpu.memory_space<vmem>>, %arg3: memref<8x1xf32, #tpu.memory_space<vmem>>, %arg4: memref<1x4x456xbf16, #tpu.memory_space<vmem>>, %arg5: memref<1x8x384xf32, #tpu.memory_space<vmem>>) attributes {dimension_semantics = [#tpu.dimension_semantics<parallel>], iteration_bounds = array<i64: 2>, scalar_prefetch = 0 : i64, scratch_operands = 0 : i64, tpu.core_type = #tpu.core_type<tc>, window_params = [{pipeline_mode = #tpu.pipeline_mode<synchronous>, transform_indices = @transform_0, window_bounds = array<i64: 9, 8, 4>}, {pipeline_mode = #tpu.pipeline_mode<synchronous>, transform_indices = @transform_1, window_bounds = array<i64: 8, 1>}, {pipeline_mode = #tpu.pipeline_mode<synchronous>, transform_indices = @transform_2, window_bounds = array<i64: 8, 1>}, {transform_indices = @transform_3, window_bounds = array<i64: 1, 4, 456>}, {transform_indices = @transform_4, window_bounds = array<i64: 1, 8, 384>}]} {
    %c0 = arith.constant 0 : index
    %c0_0 = arith.constant 0 : index
    %c0_1 = arith.constant 0 : index
    %0 = vector.load %arg4[%c0, %c0_0, %c0_1] : memref<1x4x456xbf16, #tpu.memory_space<vmem>>, vector<1x4x456xbf16>
    %1 = vector.shape_cast %0 : vector<1x4x456xbf16> to vector<4x456xbf16>
    %cst = arith.constant 0.000000e+00 : f32
    %2 = vector.broadcast %cst : f32 to vector<8x384xf32>
    %3 = vector.extract_strided_slice %1 {offsets = [0, 0], sizes = [4, 384], strides = [1, 1]} : vector<4x456xbf16> to vector<4x384xbf16>
    %c0_2 = arith.constant 0 : index
    %c0_3 = arith.constant 0 : index
    %c0_4 = arith.constant 0 : index
    %4 = vector.load %arg1[%c0_2, %c0_3, %c0_4] : memref<9x8x4xbf16, #tpu.memory_space<vmem>>, vector<1x8x4xbf16>
    %5 = vector.shape_cast %4 : vector<1x8x4xbf16> to vector<8x4xbf16>
    %cst_5 = arith.constant dense<0.000000e+00> : vector<8x384xf32>
    %6 = tpu.matmul %5, %3, %cst_5 {dimension_numbers = #tpu.dot_dimension_numbers<[1], [0], [0], [1], [0, 0, 1, 1], [], []>} : vector<8x4xbf16>, vector<4x384xbf16>, vector<8x384xf32> -> vector<8x384xf32>
    %7 = arith.addf %2, %6 : vector<8x384xf32>
    %8 = vector.extract_strided_slice %1 {offsets = [0, 1], sizes = [4, 384], strides = [1, 1]} : vector<4x456xbf16> to vector<4x384xbf16>
    %c1 = arith.constant 1 : index
    %c0_6 = arith.constant 0 : index
    %c0_7 = arith.constant 0 : index
    %9 = vector.load %arg1[%c1, %c0_6, %c0_7] : memref<9x8x4xbf16, #tpu.memory_space<vmem>>, vector<1x8x4xbf16>
    %10 = vector.shape_cast %9 : vector<1x8x4xbf16> to vector<8x4xbf16>
    %cst_8 = arith.constant dense<0.000000e+00> : vector<8x384xf32>
    %11 = tpu.matmul %10, %8, %cst_8 {dimension_numbers = #tpu.dot_dimension_numbers<[1], [0], [0], [1], [0, 0, 1, 1], [], []>} : vector<8x4xbf16>, vector<4x384xbf16>, vector<8x384xf32> -> vector<8x384xf32>
    %12 = arith.addf %7, %11 : vector<8x384xf32>
    %13 = vector.extract_strided_slice %1 {offsets = [0, 2], sizes = [4, 384], strides = [1, 1]} : vector<4x456xbf16> to vector<4x384xbf16>
    %c2 = arith.constant 2 : index
    %c0_9 = arith.constant 0 : index
    %c0_10 = arith.constant 0 : index
    %14 = vector.load %arg1[%c2, %c0_9, %c0_10] : memref<9x8x4xbf16, #tpu.memory_space<vmem>>, vector<1x8x4xbf16>
    %15 = vector.shape_cast %14 : vector<1x8x4xbf16> to vector<8x4xbf16>
    %cst_11 = arith.constant dense<0.000000e+00> : vector<8x384xf32>
    %16 = tpu.matmul %15, %13, %cst_11 {dimension_numbers = #tpu.dot_dimension_numbers<[1], [0], [0], [1], [0, 0, 1, 1], [], []>} : vector<8x4xbf16>, vector<4x384xbf16>, vector<8x384xf32> -> vector<8x384xf32>
    %17 = arith.addf %12, %16 : vector<8x384xf32>
    %18 = vector.extract_strided_slice %1 {offsets = [0, 24], sizes = [4, 384], strides = [1, 1]} : vector<4x456xbf16> to vector<4x384xbf16>
    %c3 = arith.constant 3 : index
    %c0_12 = arith.constant 0 : index
    %c0_13 = arith.constant 0 : index
    %19 = vector.load %arg1[%c3, %c0_12, %c0_13] : memref<9x8x4xbf16, #tpu.memory_space<vmem>>, vector<1x8x4xbf16>
    %20 = vector.shape_cast %19 : vector<1x8x4xbf16> to vector<8x4xbf16>
    %cst_14 = arith.constant dense<0.000000e+00> : vector<8x384xf32>
    %21 = tpu.matmul %20, %18, %cst_14 {dimension_numbers = #tpu.dot_dimension_numbers<[1], [0], [0], [1], [0, 0, 1, 1], [], []>} : vector<8x4xbf16>, vector<4x384xbf16>, vector<8x384xf32> -> vector<8x384xf32>
    %22 = arith.addf %17, %21 : vector<8x384xf32>
    %23 = vector.extract_strided_slice %1 {offsets = [0, 25], sizes = [4, 384], strides = [1, 1]} : vector<4x456xbf16> to vector<4x384xbf16>
    %c4 = arith.constant 4 : index
    %c0_15 = arith.constant 0 : index
    %c0_16 = arith.constant 0 : index
    %24 = vector.load %arg1[%c4, %c0_15, %c0_16] : memref<9x8x4xbf16, #tpu.memory_space<vmem>>, vector<1x8x4xbf16>
    %25 = vector.shape_cast %24 : vector<1x8x4xbf16> to vector<8x4xbf16>
    %cst_17 = arith.constant dense<0.000000e+00> : vector<8x384xf32>
    %26 = tpu.matmul %25, %23, %cst_17 {dimension_numbers = #tpu.dot_dimension_numbers<[1], [0], [0], [1], [0, 0, 1, 1], [], []>} : vector<8x4xbf16>, vector<4x384xbf16>, vector<8x384xf32> -> vector<8x384xf32>
    %27 = arith.addf %22, %26 : vector<8x384xf32>
    %28 = vector.extract_strided_slice %1 {offsets = [0, 26], sizes = [4, 384], strides = [1, 1]} : vector<4x456xbf16> to vector<4x384xbf16>
    %c5 = arith.constant 5 : index
    %c0_18 = arith.constant 0 : index
    %c0_19 = arith.constant 0 : index
    %29 = vector.load %arg1[%c5, %c0_18, %c0_19] : memref<9x8x4xbf16, #tpu.memory_space<vmem>>, vector<1x8x4xbf16>
    %30 = vector.shape_cast %29 : vector<1x8x4xbf16> to vector<8x4xbf16>
    %cst_20 = arith.constant dense<0.000000e+00> : vector<8x384xf32>
    %31 = tpu.matmul %30, %28, %cst_20 {dimension_numbers = #tpu.dot_dimension_numbers<[1], [0], [0], [1], [0, 0, 1, 1], [], []>} : vector<8x4xbf16>, vector<4x384xbf16>, vector<8x384xf32> -> vector<8x384xf32>
    %32 = arith.addf %27, %31 : vector<8x384xf32>
    %33 = vector.extract_strided_slice %1 {offsets = [0, 48], sizes = [4, 384], strides = [1, 1]} : vector<4x456xbf16> to vector<4x384xbf16>
    %c6 = arith.constant 6 : index
    %c0_21 = arith.constant 0 : index
    %c0_22 = arith.constant 0 : index
    %34 = vector.load %arg1[%c6, %c0_21, %c0_22] : memref<9x8x4xbf16, #tpu.memory_space<vmem>>, vector<1x8x4xbf16>
    %35 = vector.shape_cast %34 : vector<1x8x4xbf16> to vector<8x4xbf16>
    %cst_23 = arith.constant dense<0.000000e+00> : vector<8x384xf32>
    %36 = tpu.matmul %35, %33, %cst_23 {dimension_numbers = #tpu.dot_dimension_numbers<[1], [0], [0], [1], [0, 0, 1, 1], [], []>} : vector<8x4xbf16>, vector<4x384xbf16>, vector<8x384xf32> -> vector<8x384xf32>
    %37 = arith.addf %32, %36 : vector<8x384xf32>
    %38 = vector.extract_strided_slice %1 {offsets = [0, 49], sizes = [4, 384], strides = [1, 1]} : vector<4x456xbf16> to vector<4x384xbf16>
    %c7 = arith.constant 7 : index
    %c0_24 = arith.constant 0 : index
    %c0_25 = arith.constant 0 : index
    %39 = vector.load %arg1[%c7, %c0_24, %c0_25] : memref<9x8x4xbf16, #tpu.memory_space<vmem>>, vector<1x8x4xbf16>
    %40 = vector.shape_cast %39 : vector<1x8x4xbf16> to vector<8x4xbf16>
    %cst_26 = arith.constant dense<0.000000e+00> : vector<8x384xf32>
    %41 = tpu.matmul %40, %38, %cst_26 {dimension_numbers = #tpu.dot_dimension_numbers<[1], [0], [0], [1], [0, 0, 1, 1], [], []>} : vector<8x4xbf16>, vector<4x384xbf16>, vector<8x384xf32> -> vector<8x384xf32>
    %42 = arith.addf %37, %41 : vector<8x384xf32>
    %43 = vector.extract_strided_slice %1 {offsets = [0, 50], sizes = [4, 384], strides = [1, 1]} : vector<4x456xbf16> to vector<4x384xbf16>
    %c8 = arith.constant 8 : index
    %c0_27 = arith.constant 0 : index
    %c0_28 = arith.constant 0 : index
    %44 = vector.load %arg1[%c8, %c0_27, %c0_28] : memref<9x8x4xbf16, #tpu.memory_space<vmem>>, vector<1x8x4xbf16>
    %45 = vector.shape_cast %44 : vector<1x8x4xbf16> to vector<8x4xbf16>
    %cst_29 = arith.constant dense<0.000000e+00> : vector<8x384xf32>
    %46 = tpu.matmul %45, %43, %cst_29 {dimension_numbers = #tpu.dot_dimension_numbers<[1], [0], [0], [1], [0, 0, 1, 1], [], []>} : vector<8x4xbf16>, vector<4x384xbf16>, vector<8x384xf32> -> vector<8x384xf32>
    %47 = arith.addf %42, %46 : vector<8x384xf32>
    %c0_30 = arith.constant 0 : index
    %c0_31 = arith.constant 0 : index
    %48 = vector.load %arg2[%c0_30, %c0_31] : memref<8x1xf32, #tpu.memory_space<vmem>>, vector<8x1xf32>
    %49 = vector.broadcast %48 : vector<8x1xf32> to vector<8x384xf32>
    %50 = arith.mulf %47, %49 : vector<8x384xf32>
    %c0_32 = arith.constant 0 : index
    %c0_33 = arith.constant 0 : index
    %51 = vector.load %arg3[%c0_32, %c0_33] : memref<8x1xf32, #tpu.memory_space<vmem>>, vector<8x1xf32>
    %52 = vector.broadcast %51 : vector<8x1xf32> to vector<8x384xf32>
    %53 = arith.addf %50, %52 : vector<8x384xf32>
    %cst_34 = arith.constant 0.000000e+00 : f32
    %54 = vector.broadcast %cst_34 : f32 to vector<8x384xf32>
    %55 = arith.cmpf oge, %53, %54 : vector<8x384xf32>
    %cst_35 = arith.constant 2.000000e-01 : f32
    %56 = vector.broadcast %cst_35 : f32 to vector<8x384xf32>
    %57 = arith.mulf %56, %53 : vector<8x384xf32>
    %58 = arith.select %55, %53, %57 : vector<8x384xi1>, vector<8x384xf32>
    %c0_36 = arith.constant 0 : index
    %c0_37 = arith.constant 0 : index
    %c0_38 = arith.constant 0 : index
    %59 = vector.load %arg5[%c0_36, %c0_37, %c0_38] : memref<1x8x384xf32, #tpu.memory_space<vmem>>, vector<1x8x384xf32>
    %60 = vector.shape_cast %59 : vector<1x8x384xf32> to vector<8x384xf32>
    %61 = vector.shape_cast %58 : vector<8x384xf32> to vector<1x8x384xf32>
    tpu.vector_store %arg5[%c0_36, %c0_37, %c0_38], %61 {strides = array<i32>} : memref<1x8x384xf32, #tpu.memory_space<vmem>>, vector<1x8x384xf32>,
    return
  }
  func.func @transform_0(%arg0: i32) -> (i32, i32, i32) {
    %c0_i32 = arith.constant 0 : i32
    %c0_i32_0 = arith.constant 0 : i32
    %c0_i32_1 = arith.constant 0 : i32
    %c0_i32_2 = arith.constant 0 : i32
    return %c0_i32, %c0_i32_0, %c0_i32_1 : i32, i32, i32
  }
  func.func @transform_1(%arg0: i32) -> (i32, i32) {
    %c0_i32 = arith.constant 0 : i32
    %c0_i32_0 = arith.constant 0 : i32
    %c0_i32_1 = arith.constant 0 : i32
    return %c0_i32, %c0_i32_0 : i32, i32
  }
  func.func @transform_2(%arg0: i32) -> (i32, i32) {
    %c0_i32 = arith.constant 0 : i32
    %c0_i32_0 = arith.constant 0 : i32
    %c0_i32_1 = arith.constant 0 : i32
    return %c0_i32, %c0_i32_0 : i32, i32
  }
  func.func @transform_3(%arg0: i32) -> (i32, i32, i32) {
    %c0_i32 = arith.constant 0 : i32
    %c0_i32_0 = arith.constant 0 : i32
    %c0_i32_1 = arith.constant 0 : i32
    return %arg0, %c0_i32, %c0_i32_0 : i32, i32, i32
  }
  func.func @transform_4(%arg0: i32) -> (i32, i32, i32) {
    %c0_i32 = arith.constant 0 : i32
    %c0_i32_0 = arith.constant 0 : i32
    %c0_i32_1 = arith.constant 0 : i32
    return %arg0, %c0_i32, %c0_i32_0 : i32, i32, i32
  }
}

</mosaic_0001>

<bundles_post_ra>
// kernel: convolution_block_forward.2
= control target key start
LH: loop header
LB: loop body
LE: loop exit
PB: predicated region body
PF: predicated region fallthrough
CT: control target
= control target key end

     0   :  { %s1091_s15 = smov 0   ;;  %s1235_s0 = inlined_call_operand.vmem [shape: bf16[9,8,4], index: 0, kind: input, shape index: {}]   ;;  %s1236_s1 = inlined_call_operand.vmem [shape: f32[1,384], index: 1, kind: input, shape index: {}]   ;;  %s1237_s2 = inlined_call_operand.vmem [shape: bf16[2,4,456], index: 2, kind: input, shape index: {}]   ;;  %s1238_s3 = inlined_call_operand.vmem [shape: f32[2,8,1], index: 3, kind: output, shape index: {0}]   ;;  %s1239_s4 = inlined_call_operand.vmem [shape: f32[2,8,1], index: 4, kind: output, shape index: {1}]  }
   0x1 LB: > { %s987_s16 = sadd.s32 4294967295, %s1056_s15   ;;  %p991_p0 = scmp.ge.s32.totalorder %s1056_s15, 1  ;;  %s1056_s15 = sphi %s1091_s15, %s15_s15  }
   0x2   : > { %p165_p1 = scmp.lt.s32.totalorder %s1056_s15, 3 }
   0x4   : > { %p166_p2 = pnand %p991_p0, %p165_p1 }
   0x5   : > { %p194_p3 = scmp.lt.s32.totalorder (!%p166_p2), %s987_s16, 1  ;;  %s1058_s21 = smov (!%p166_p2), 127  }
   0x6   : > { %169 = sbr.rel (%p166_p2) target bundleno = 507 (0x1fb), region = 32  ;;  %s1059_s22 = smov (!%p166_p2), 126  }
   0x7   : > { %s1060_s23 = smov (!%p166_p2), 104   ;;  %s1061_s24 = smov (!%p166_p2), 103  }
   0x8   : > { %s1062_s25 = smov (!%p166_p2), 102   ;;  %s1063_s26 = smov (!%p166_p2), 80  }
   0x9   : > { %s1064_s27 = smov (!%p166_p2), 79   ;;  %s1065_s28 = smov (!%p166_p2), 78  }
   0xb   : > { %s1241_s16 = smov (!%p194_p3, %s987_s16), 1  ;;  %vm238_vm0 = vcmask 1041408   ;;  %v209_v37 = vld [vmem:[%s1235_s0] sm:$0xf]  ;;  %vm234_vm1 = vcmask 31744   ;;  %vm358_vm2 = vcmask 1031168  }
   0xc   : > { %s1099_s17 = sshll.u32 %s1241_s16, 3  ;;  %vm230_vm3 = vcmask 1039360   ;;  %v996_v54 = vld [vmem:[%s1235_s0 + $0x4] sm:$0xf]  ;;  %vm435_vm4 = vcmask 850944   ;;  %vm512_vm5 = vcmask 842752  }
   0xd   : > { %s198_s20 = scalar_lea.vmem %s1237_s2, %s1099_s17  ;;  %v1003_v61 = vld [vmem:[%s1235_s0 + $0x8] sm:$0xf]  ;;  %vm589_vm6 = vcmask 834560   ;;  %vm666_vm7 = vcmask 654336   ;;  %vm743_vm8 = vcmask 646144   ;;  %vm820_vm9 = vcmask 637952   ;;  %s206_s30 = scalar_lea.vmem %s1239_s4, %s1099_s17 }
   0xe   : > { %v1105_v0 = vld [vmem:[%s198_s20] sm:$0xff]  ;;  %vm893_vm10 = vcmask 7168  }
   0xf   : > { %213 = vst [vmem:[#allocation1] ss:$4 sm:$0xff] %v1105_v0 }
  0x16   : > { %v218_v1 = vld.sshfl [vmem:[#allocation1 + $0x10] sm:$0xff pattern:$0x73625140]  ;;  %v214_v2 = vld.sshfl [vmem:[#allocation1] sm:$0xff pattern:$0x73625140] }
  0x17   : > { %226 = vrot.lane.b32.xlu0 %v218_v1, %s1058_s21  ;;  %222 = vrot.lane.b32.xlu1 %v214_v2, %s1058_s21  ;;  %v220_v3 = vld.sshfl [vmem:[#allocation1 + $0x18] sm:$0xff pattern:$0x73625140]  ;;  %v216_v4 = vld.sshfl [vmem:[#allocation1 + $0x8] sm:$0xff pattern:$0x73625140] }
  0x18   : > { %287 = vst [vmem:[#allocation1] ss:$4 sm:$0xff] %v1105_v0 }
  0x1f   : > { %228 = vrot.lane.b32.xlu0 %v220_v3, %s1058_s21  ;;  %224 = vrot.lane.b32.xlu1 %v216_v4, %s1058_s21  ;;  %v1109_v5 = vld.sshfl [vmem:[#allocation1] sm:$0xff pattern:$0x73625140]  ;;  %v1111_v6 = vld.sshfl [vmem:[#allocation1 + $0x8] sm:$0xff pattern:$0x73625140] }
  0x20   : > { %v1113_v7 = vld.sshfl [vmem:[#allocation1 + $0x10] sm:$0xff pattern:$0x73625140]  ;;  %v294_v34 = vsel %vm238_vm0, %v1109_v5, 0  ;;  %v296_v45 = vsel %vm238_vm0, %v1111_v6, 0 }
  0x21   : > { %341 = vst [vmem:[#allocation1] ss:$4 sm:$0xff] %v1105_v0  ;;  %307 = vmatpush.bf16.msra.mxu3 %v294_v34  ;;  %v298_v49 = vsel %vm238_vm0, %v1113_v7, 0 }
  0x24   : > { %1000 = vmatmul.msk.bf16.vlgmr.msra.gmra.mxu3 %vm234_vm1, %v209_v37 }
  0x28   : > { %v344_v8 = vld.sshfl [vmem:[#allocation1 + $0x8] sm:$0xff pattern:$0x73625140]  ;;  %v346_v9 = vld.sshfl [vmem:[#allocation1 + $0x10] sm:$0xff pattern:$0x73625140] }
  0x29   : > { %354 = vrot.lane.b32.xlu0 %v346_v9, %s1059_s22  ;;  %v342_v10 = vld.sshfl [vmem:[#allocation1] sm:$0xff pattern:$0x73625140]  ;;  %v348_v11 = vld.sshfl [vmem:[#allocation1 + $0x18] sm:$0xff pattern:$0x73625140] }
  0x2a   : > { %350 = vrot.lane.b32.xlu2 %v342_v10, %s1059_s22  ;;  %418 = vst [vmem:[#allocation1] ss:$4 sm:$0xff] %v1105_v0 }
  0x31   : > { %356 = vrot.lane.b32.xlu0 %v348_v11, %s1059_s22  ;;  %v421_v12 = vld.sshfl [vmem:[#allocation1 + $0x8] sm:$0xff pattern:$0x73625140]  ;;  %v423_v13 = vld.sshfl [vmem:[#allocation1 + $0x10] sm:$0xff pattern:$0x73625140] }
  0x32   : > { %v425_v14 = vld.sshfl [vmem:[#allocation1 + $0x18] sm:$0xff pattern:$0x73625140]  ;;  %429 = vrot.lane.b32.xlu1 %v421_v12, %s1060_s23  ;;  %352 = vrot.lane.b32.xlu2 %v344_v8, %s1059_s22  ;;  %v419_v15 = vld.sshfl [vmem:[#allocation1] sm:$0xff pattern:$0x73625140] }
  0x33   : > { %495 = vst [vmem:[#allocation1] ss:$4 sm:$0xff] %v1105_v0  ;;  %v1007_v11 = vld [vmem:[%s1235_s0 + $0xc] sm:$0xf] }
  0x3a   : > { %427 = vrot.lane.b32.xlu1 %v419_v15, %s1060_s23  ;;  %v500_v16 = vld.sshfl [vmem:[#allocation1 + $0x10] sm:$0xff pattern:$0x73625140]  ;;  %v496_v17 = vld.sshfl [vmem:[#allocation1] sm:$0xff pattern:$0x73625140]  ;;  %431 = vrot.lane.b32.xlu2 %v423_v13, %s1060_s23 }
  0x3b   : > { %508 = vrot.lane.b32.xlu0 %v500_v16, %s1061_s24  ;;  %v502_v18 = vld.sshfl [vmem:[#allocation1 + $0x18] sm:$0xff pattern:$0x73625140]  ;;  %v498_v19 = vld.sshfl [vmem:[#allocation1 + $0x8] sm:$0xff pattern:$0x73625140] }
  0x3c   : > { %572 = vst [vmem:[#allocation1] ss:$4 sm:$0xff] %v1105_v0 }
  0x42   : > { %510 = vrot.lane.b32.xlu1 %v502_v18, %s1061_s24  ;;  %433 = vrot.lane.b32.xlu2 %v425_v14, %s1060_s23 }
  0x43   : > { %506 = vrot.lane.b32.xlu0 %v498_v19, %s1061_s24  ;;  %v575_v20 = vld.sshfl [vmem:[#allocation1 + $0x8] sm:$0xff pattern:$0x73625140]  ;;  %v577_v21 = vld.sshfl [vmem:[#allocation1 + $0x10] sm:$0xff pattern:$0x73625140] }
  0x44   : > { %v579_v22 = vld.sshfl [vmem:[#allocation1 + $0x18] sm:$0xff pattern:$0x73625140]  ;;  %v573_v23 = vld.sshfl [vmem:[#allocation1] sm:$0xff pattern:$0x73625140] }
  0x45   : > { %649 = vst [vmem:[#allocation1] ss:$4 sm:$0xff] %v1105_v0 }
  0x4a   : > { %581 = vrot.lane.b32.xlu1 %v573_v23, %s1062_s25  ;;  %504 = vrot.lane.b32.xlu2 %v496_v17, %s1061_s24 }
  0x4c   : > { %v656_v24 = vld.sshfl [vmem:[#allocation1 + $0x18] sm:$0xff pattern:$0x73625140]  ;;  %v650_v25 = vld.sshfl [vmem:[#allocation1] sm:$0xff pattern:$0x73625140] }
  0x4d   : > { %658 = vrot.lane.b32.xlu0 %v650_v25, %s1063_s26  ;;  %v652_v26 = vld.sshfl [vmem:[#allocation1 + $0x8] sm:$0xff pattern:$0x73625140]  ;;  %v654_v27 = vld.sshfl [vmem:[#allocation1 + $0x10] sm:$0xff pattern:$0x73625140] }
  0x4e   : > { %726 = vst [vmem:[#allocation1] ss:$4 sm:$0xff] %v1105_v0 }
  0x52   : > { %660 = vrot.lane.b32.xlu1 %v652_v26, %s1063_s26  ;;  %583 = vrot.lane.b32.xlu2 %v575_v20, %s1062_s25 }
  0x55   : > { %587 = vrot.lane.b32.xlu0 %v579_v22, %s1062_s25  ;;  %v727_v28 = vld.sshfl [vmem:[#allocation1] sm:$0xff pattern:$0x73625140]  ;;  %v729_v29 = vld.sshfl [vmem:[#allocation1 + $0x8] sm:$0xff pattern:$0x73625140] }
  0x56   : > { %v731_v30 = vld.sshfl [vmem:[#allocation1 + $0x10] sm:$0xff pattern:$0x73625140]  ;;  %v733_v31 = vld.sshfl [vmem:[#allocation1 + $0x18] sm:$0xff pattern:$0x73625140] }
  0x57   : > { %803 = vst [vmem:[#allocation1] ss:$4 sm:$0xff] %v1105_v0 }
  0x5a   : > { %662 = vrot.lane.b32.xlu1 %v654_v27, %s1063_s26  ;;  %585 = vrot.lane.b32.xlu2 %v577_v21, %s1062_s25 }
  0x5d   : > { %739 = vrot.lane.b32.xlu0 %v731_v30, %s1064_s27  ;;  %v1011_v30 = vld [vmem:[%s1235_s0 + $0x10] sm:$0xf] }
  0x5e   : > { %v808_v32 = vld.sshfl [vmem:[#allocation1 + $0x10] sm:$0xff pattern:$0x73625140]  ;;  %v804_v33 = vld.sshfl [vmem:[#allocation1] sm:$0xff pattern:$0x73625140] }
  0x5f   : > { %v806_v35 = vld.sshfl [vmem:[#allocation1 + $0x8] sm:$0xff pattern:$0x73625140]  ;;  %v810_v36 = vld.sshfl [vmem:[#allocation1 + $0x18] sm:$0xff pattern:$0x73625140] }
  0x62   : > { %664 = vrot.lane.b32.xlu1 %v656_v24, %s1063_s26  ;;  %737 = vrot.lane.b32.xlu2 %v729_v29, %s1064_s27 }
  0x65   : > { %741 = vrot.lane.b32.xlu0 %v733_v31, %s1064_s27 }
  0x6a   : > { %816 = vrot.lane.b32.xlu1 %v808_v32, %s1065_s28  ;;  %735 = vrot.lane.b32.xlu2 %v727_v28, %s1064_s27  ;;  %v1015_v28 = vld [vmem:[%s1235_s0 + $0x14] sm:$0xf]  ;;  %s202_s27 = scalar_lea.vmem %s1238_s3, %s1099_s17 }
  0x6d   : > { %812 = vrot.lane.b32.xlu0 %v804_v33, %s1065_s28 }
  0x72   : > { %814 = vrot.lane.b32.xlu1 %v806_v35, %s1065_s28  ;;  %818 = vrot.lane.b32.xlu2 %v810_v36, %s1065_s28 }
  0x84   : > { %v351_v38 = vpop.permute.xlu2 %350 }
  0x89   : > { %v227_v39 = vpop.permute.xlu0 %226  ;;  %v223_v40 = vpop.permute.xlu1 %222 }
  0x8c   : > { %v353_v41 = vpop.permute.xlu2 %352 }
  0x8d   : > { %v359_v42 = vsel %vm358_vm2, %v351_v38, %v353_v41 }
  0x8e   : > { %v366_v53 = vsel %vm238_vm0, %v359_v42, 0 }
  0x91   : > { %v229_v43 = vpop.permute.xlu0 %228  ;;  %v225_v44 = vpop.permute.xlu1 %224 }
  0x92   : > { %v231_v46 = vsel %vm230_vm3, %v223_v40, %v225_v44  ;;  %v232_v47 = vsel %vm230_vm3, %v225_v44, %v227_v39  ;;  %v233_v48 = vsel %vm230_vm3, %v227_v39, %v229_v43  ;;  %v1019_v43 = vld [vmem:[%s1235_s0 + $0x18] sm:$0xf] }
  0x93   : > { %v240_v50 = vsel %vm238_vm0, %v231_v46, 0  ;;  %v243_v51 = vsel %vm238_vm0, %v232_v47, 0  ;;  %v246_v52 = vsel %vm238_vm0, %v233_v48, 0 }
  0x94   : > { %255 = vmatpush.bf16.msra.mxu0 %v240_v50  ;;  %268 = vmatpush.bf16.msra.mxu1 %v243_v51  ;;  %v432_v55 = vpop.permute.xlu2 %431 }
  0x95   : > { %281 = vmatpush.bf16.msra.mxu2 %v246_v52 }
  0x97   : > { %997 = vmatmul.msk.bf16.vlgmr.msra.gmra.mxu0 %vm234_vm1, %v996_v54  ;;  %998 = vmatmul.msk.bf16.vlgmr.msra.gmra.mxu1 %vm234_vm1, %v996_v54 }
  0x98   : > { %320 = vmatpush.bf16.msrb.mxu0 %v296_v45  ;;  %333 = vmatpush.bf16.msrb.mxu1 %v298_v49 }
  0x99   : > { %381 = vmatpush.bf16.msrb.mxu2 %v366_v53 }
  0x9a   : > { %999 = vmatmul.msk.bf16.vlgmr.msra.gmra.mxu2 %vm234_vm1, %v996_v54 }
  0x9b   : > { %v355_v56 = vpop.permute.xlu0 %354 }
  0x9c   : > { %v360_v57 = vsel %vm358_vm2, %v353_v41, %v355_v56  ;;  %v434_v58 = vpop.permute.xlu2 %433 }
  0x9d   : > { %v369_v59 = vsel %vm238_vm0, %v360_v57, 0  ;;  %v438_v60 = vsel %vm435_vm4, %v432_v55, %v434_v58 }
  0x9e   : > { %394 = vmatpush.bf16.msrb.mxu3 %v369_v59  ;;  %v449_v62 = vsel %vm238_vm0, %v438_v60, 0 }
  0xa1   : > { %1005 = vmatmul.msk.bf16.vlgmr.msrb.gmra.mxu3 %vm234_vm1, %v1003_v61 }
  0xa2   : > { %484 = vmatpush.bf16.msra.mxu3 %v449_v62 }
  0xa3   : > { %v357_v63 = vpop.permute.xlu0 %356 }
  0xa4   : > { %v361_v0 = vsel %vm358_vm2, %v355_v56, %v357_v63  ;;  %v430_v1 = vpop.permute.xlu1 %429  ;;  %v505_v2 = vpop.permute.xlu2 %504  ;;  %v1023_v56 = vld [vmem:[%s1235_s0 + $0x1c] sm:$0xf]  ;;  %v1027_v63 = vld [vmem:[%s1235_s0 + $0x20] sm:$0xf] }
  0xa5   : > { %v372_v3 = vsel %vm238_vm0, %v361_v0, 0  ;;  %v437_v4 = vsel %vm435_vm4, %v430_v1, %v432_v55 }
  0xa6   : > { %v446_v5 = vsel %vm238_vm0, %v437_v4, 0  ;;  %407 = vmatpush.bf16.msra.mxu0 %v372_v3 }
  0xa7   : > { %471 = vmatpush.bf16.msra.mxu2 %v446_v5  ;;  %1001 = vmatmul.msk.bf16.vlgmr.msrb.gmra.mxu0 %vm234_vm1, %v209_v37  ;;  %v309_v0 = vpop.f32.mrf.mxu3 }
  0xa8   : > { %1002 = vmatmul.msk.bf16.vlgmr.msrb.gmra.mxu1 %vm234_vm1, %v209_v37 }
  0xaa   : > { %1004 = vmatmul.msk.bf16.vlgmr.msrb.gmra.mxu2 %vm234_vm1, %v1003_v61 }
  0xac   : > { %v428_v6 = vpop.permute.xlu1 %427  ;;  %v584_v7 = vpop.permute.xlu2 %583 }
  0xad   : > { %v436_v8 = vsel %vm435_vm4, %v428_v6, %v430_v1  ;;  %v509_v9 = vpop.permute.xlu0 %508 }
  0xae   : > { %v443_v10 = vsel %vm238_vm0, %v436_v8, 0 }
  0xaf   : > { %458 = vmatpush.bf16.msra.mxu1 %v443_v10  ;;  %v311_v1 = vpop.f32.mrf.mxu3 }
  0xb1   : > { %1010 = vmatmul.msk.bf16.vlgmr.msra.gmra.mxu3 %vm234_vm1, %v1007_v11 }
  0xb4   : > { %v511_v12 = vpop.permute.xlu1 %510  ;;  %v586_v13 = vpop.permute.xlu2 %585 }
  0xb5   : > { %v515_v14 = vsel %vm512_vm5, %v509_v9, %v511_v12  ;;  %v507_v15 = vpop.permute.xlu0 %506  ;;  %v591_v16 = vsel %vm589_vm6, %v584_v7, %v586_v13 }
  0xb6   : > { %v526_v17 = vsel %vm238_vm0, %v515_v14, 0  ;;  %v514_v18 = vsel %vm512_vm5, %v507_v15, %v509_v9  ;;  %v513_v19 = vsel %vm512_vm5, %v505_v2, %v507_v15  ;;  %v600_v22 = vsel %vm238_vm0, %v591_v16, 0 }
  0xb7   : > { %v523_v20 = vsel %vm238_vm0, %v514_v18, 0  ;;  %v520_v21 = vsel %vm238_vm0, %v513_v19, 0  ;;  %561 = vmatpush.bf16.msrb.mxu2 %v526_v17  ;;  %1006 = vmatmul.msk.bf16.vlgmr.msra.gmra.mxu0 %vm234_vm1, %v1003_v61 }
  0xb8   : > { %548 = vmatpush.bf16.msrb.mxu1 %v523_v20  ;;  %535 = vmatpush.bf16.msrb.mxu0 %v520_v21 }
  0xb9   : > { %1008 = vmatmul.msk.bf16.vlgmr.msra.gmra.mxu1 %vm234_vm1, %v1007_v11 }
  0xba   : > { %1009 = vmatmul.msk.bf16.vlgmr.msra.gmra.mxu2 %vm234_vm1, %v1007_v11 }
  0xbc   : > { %625 = vmatpush.bf16.msra.mxu0 %v600_v22  ;;  %v582_v23 = vpop.permute.xlu1 %581  ;;  %v738_v24 = vpop.permute.xlu2 %737 }
  0xbd   : > { %v590_v25 = vsel %vm589_vm6, %v582_v23, %v584_v7 }
  0xbe   : > { %v597_v26 = vsel %vm238_vm0, %v590_v25, 0 }
  0xbf   : > { %v659_v27 = vpop.permute.xlu0 %658  ;;  %612 = vmatpush.bf16.msrb.mxu3 %v597_v26 }
  0xc2   : > { %1016 = vmatmul.msk.bf16.vlgmr.msrb.gmra.mxu3 %vm234_vm1, %v1015_v28 }
  0xc4   : > { %v661_v29 = vpop.permute.xlu1 %660  ;;  %v736_v31 = vpop.permute.xlu2 %735 }
  0xc5   : > { %v667_v32 = vsel %vm666_vm7, %v659_v27, %v661_v29  ;;  %v744_v33 = vsel %vm743_vm8, %v736_v31, %v738_v24 }
  0xc6   : > { %v674_v34 = vsel %vm238_vm0, %v667_v32, 0  ;;  %v751_v37 = vsel %vm238_vm0, %v744_v33, 0 }
  0xc7   : > { %689 = vmatpush.bf16.msra.mxu2 %v674_v34  ;;  %v588_v35 = vpop.permute.xlu0 %587  ;;  %1012 = vmatmul.msk.bf16.vlgmr.msrb.gmra.mxu0 %vm234_vm1, %v1011_v30 }
  0xc8   : > { %v592_v36 = vsel %vm589_vm6, %v586_v13, %v588_v35 }
  0xc9   : > { %v603_v38 = vsel %vm238_vm0, %v592_v36, 0  ;;  %1013 = vmatmul.msk.bf16.vlgmr.msrb.gmra.mxu1 %vm234_vm1, %v1011_v30 }
  0xca   : > { %1014 = vmatmul.msk.bf16.vlgmr.msrb.gmra.mxu2 %vm234_vm1, %v1011_v30  ;;  %638 = vmatpush.bf16.msra.mxu1 %v603_v38 }
  0xcc   : > { %v663_v39 = vpop.permute.xlu1 %662  ;;  %v819_v52 = vpop.permute.xlu2 %818 }
  0xcd   : > { %v668_v40 = vsel %vm666_vm7, %v661_v29, %v663_v39 }
  0xce   : > { %766 = vmatpush.bf16.msrb.mxu1 %v751_v37  ;;  %v677_v41 = vsel %vm238_vm0, %v668_v40, 0 }
  0xcf   : > { %702 = vmatpush.bf16.msra.mxu3 %v677_v41  ;;  %v740_v42 = vpop.permute.xlu0 %739 }
  0xd0   : > { %v745_v44 = vsel %vm743_vm8, %v738_v24, %v740_v42 }
  0xd1   : > { %v754_v45 = vsel %vm238_vm0, %v745_v44, 0 }
  0xd2   : > { %1021 = vmatmul.msk.bf16.vlgmr.msra.gmra.mxu3 %vm234_vm1, %v1019_v43  ;;  %779 = vmatpush.bf16.msrb.mxu2 %v754_v45 }
  0xd4   : > { %v665_v46 = vpop.permute.xlu1 %664 }
  0xd5   : > { %v669_v47 = vsel %vm666_vm7, %v663_v39, %v665_v46 }
  0xd6   : > { %v680_v48 = vsel %vm238_vm0, %v669_v47, 0 }
  0xd7   : > { %715 = vmatpush.bf16.msrb.mxu0 %v680_v48  ;;  %v742_v49 = vpop.permute.xlu0 %741 }
  0xd8   : > { %v746_v50 = vsel %vm743_vm8, %v740_v42, %v742_v49  ;;  %1017 = vmatmul.msk.bf16.vlgmr.msra.gmra.mxu0 %vm234_vm1, %v1015_v28 }
  0xd9   : > { %v757_v51 = vsel %vm238_vm0, %v746_v50, 0  ;;  %1018 = vmatmul.msk.bf16.vlgmr.msra.gmra.mxu1 %vm234_vm1, %v1015_v28 }
  0xda   : > { %1020 = vmatmul.msk.bf16.vlgmr.msra.gmra.mxu2 %vm234_vm1, %v1019_v43  ;;  %792 = vmatpush.bf16.msrb.mxu3 %v757_v51 }
  0xdc   : > { %v817_v53 = vpop.permute.xlu1 %816 }
  0xdd   : > { %v823_v54 = vsel %vm820_vm9, %v817_v53, %v819_v52 }
  0xde   : > { %v834_v55 = vsel %vm238_vm0, %v823_v54, 0 }
  0xdf   : > { %869 = vmatpush.bf16.msra.mxu2 %v834_v55  ;;  %v813_v57 = vpop.permute.xlu0 %812 }
  0xe2   : > { %1026 = vmatmul.msk.bf16.vlgmr.msrb.gmra.mxu3 %vm234_vm1, %v1023_v56 }
  0xe4   : > { %v815_v58 = vpop.permute.xlu1 %814 }
  0xe5   : > { %v822_v59 = vsel %vm820_vm9, %v815_v58, %v817_v53  ;;  %v821_v60 = vsel %vm820_vm9, %v813_v57, %v815_v58 }
  0xe6   : > { %v831_v61 = vsel %vm238_vm0, %v822_v59, 0  ;;  %v828_v62 = vsel %vm238_vm0, %v821_v60, 0  ;;  %v878_v60 = vld [vmem:[%s1236_s1] sm:$0x7] }
  0xe7   : > { %856 = vmatpush.bf16.msra.mxu1 %v831_v61  ;;  %843 = vmatpush.bf16.msra.mxu0 %v828_v62 }
  0xe8   : > { %1022 = vmatmul.msk.bf16.vlgmr.msrb.gmra.mxu0 %vm234_vm1, %v1019_v43 }
  0xe9   : > { %1024 = vmatmul.msk.bf16.vlgmr.msrb.gmra.mxu1 %vm234_vm1, %v1023_v56 }
  0xea   : > { %1025 = vmatmul.msk.bf16.vlgmr.msrb.gmra.mxu2 %vm234_vm1, %v1023_v56 }
  0xf8   : > { %1028 = vmatmul.msk.bf16.vlgmr.msra.gmra.mxu0 %vm234_vm1, %v1027_v63 }
  0xf9   : > { %1029 = vmatmul.msk.bf16.vlgmr.msra.gmra.mxu1 %vm234_vm1, %v1027_v63 }
  0xfa   : > { %1030 = vmatmul.msk.bf16.vlgmr.msra.gmra.mxu2 %vm234_vm1, %v1027_v63 }
 0x114   : > { %v257_v2 = vpop.f32.mrf.mxu0  ;;  %v270_v3 = vpop.f32.mrf.mxu1 }
 0x115   : > { %v310_v4 = vadd.f32 %v309_v0, %v257_v2 }
 0x11c   : > { %v259_v6 = vpop.f32.mrf.mxu0  ;;  %v272_v7 = vpop.f32.mrf.mxu1 }
 0x11d   : > { %v283_v5 = vpop.f32.mrf.mxu2  ;;  %v881_v6 = vperm.slane %v878_v60, 1 }
 0x124   : > { %v322_v9 = vpop.f32.mrf.mxu0  ;;  %v396_v10 = vpop.f32.mrf.mxu3 }
 0x125   : > { %v285_v8 = vpop.f32.mrf.mxu2  ;;  %v323_v11 = vadd.f32 %v322_v9, %v270_v3  ;;  %v335_v12 = vpop.f32.mrf.mxu1  ;;  %v880_v3 = vperm.slane %v878_v60, 0 }
 0x126   : > { %v336_v13 = vadd.f32 %v335_v12, %v283_v5 }
 0x127   : > { %v414_v14 = vadd.f32 %v396_v10, %v323_v11 }
 0x12c   : > { %v324_v17 = vpop.f32.mrf.mxu0  ;;  %v398_v18 = vpop.f32.mrf.mxu3 }
 0x12d   : > { %v383_v15 = vpop.f32.mrf.mxu2  ;;  %v337_v19 = vpop.f32.mrf.mxu1 }
 0x12e   : > { %v413_v16 = vadd.f32 %v383_v15, %v310_v4  ;;  %v882_v15 = vperm.slane %v878_v60, 2 }
 0x134   : > { %v409_v21 = vpop.f32.mrf.mxu0  ;;  %v486_v22 = vpop.f32.mrf.mxu3 }
 0x135   : > { %v385_v20 = vpop.f32.mrf.mxu2  ;;  %v415_v51 = vadd.f32 %v409_v21, %v336_v13 }
 0x136   : > { %v460_v23 = vpop.f32.mrf.mxu1 }
 0x137   : > { %v490_v48 = vadd.f32 %v460_v23, %v413_v16  ;;  %v492_v58 = vadd.f32 %v486_v22, %v415_v51 }
 0x13c   : > { %v411_v25 = vpop.f32.mrf.mxu0  ;;  %v488_v26 = vpop.f32.mrf.mxu3 }
 0x13d   : > { %v473_v24 = vpop.f32.mrf.mxu2 }
 0x13e   : > { %v462_v27 = vpop.f32.mrf.mxu1  ;;  %v491_v49 = vadd.f32 %v473_v24, %v414_v14 }
 0x144   : > { %v537_v29 = vpop.f32.mrf.mxu0 }
 0x145   : > { %v475_v28 = vpop.f32.mrf.mxu2  ;;  %v614_v30 = vpop.f32.mrf.mxu3  ;;  %v567_v52 = vadd.f32 %v537_v29, %v490_v48 }
 0x146   : > { %v550_v31 = vpop.f32.mrf.mxu1 }
 0x147   : > { %v568_v53 = vadd.f32 %v550_v31, %v491_v49  ;;  %v644_v59 = vadd.f32 %v614_v30, %v567_v52 }
 0x14c   : > { %v539_v33 = vpop.f32.mrf.mxu0 }
 0x14d   : > { %v563_v32 = vpop.f32.mrf.mxu2  ;;  %v616_v34 = vpop.f32.mrf.mxu3 }
 0x14e   : > { %v552_v35 = vpop.f32.mrf.mxu1  ;;  %v569_v61 = vadd.f32 %v563_v32, %v492_v58 }
 0x155   : > { %v565_v36 = vpop.f32.mrf.mxu2  ;;  %v627_v37 = vpop.f32.mrf.mxu0 }
 0x156   : > { %v704_v38 = vpop.f32.mrf.mxu3  ;;  %v640_v39 = vpop.f32.mrf.mxu1  ;;  %v645_v57 = vadd.f32 %v627_v37, %v568_v53 }
 0x157   : > { %v646_v1 = vadd.f32 %v640_v39, %v569_v61 }
 0x158   : > { %v722_v63 = vadd.f32 %v704_v38, %v645_v57 }
 0x15d   : > { %v691_v40 = vpop.f32.mrf.mxu2  ;;  %v629_v41 = vpop.f32.mrf.mxu0 }
 0x15e   : > { %v706_v42 = vpop.f32.mrf.mxu3  ;;  %v642_v43 = vpop.f32.mrf.mxu1  ;;  %v721_v62 = vadd.f32 %v691_v40, %v644_v59 }
 0x165   : > { %v693_v44 = vpop.f32.mrf.mxu2  ;;  %v717_v45 = vpop.f32.mrf.mxu0 }
 0x166   : > { %v794_v46 = vpop.f32.mrf.mxu3  ;;  %v768_v47 = vpop.f32.mrf.mxu1  ;;  %v723_v7 = vadd.f32 %v717_v45, %v646_v1 }
 0x167   : > { %v798_v2 = vadd.f32 %v768_v47, %v721_v62 }
 0x168   : > { %v800_v13 = vadd.f32 %v794_v46, %v723_v7 }
 0x16d   : > { %v781_v50 = vpop.f32.mrf.mxu2  ;;  %v719_v54 = vpop.f32.mrf.mxu0 }
 0x16e   : > { %v796_v55 = vpop.f32.mrf.mxu3  ;;  %v770_v56 = vpop.f32.mrf.mxu1  ;;  %v799_v4 = vadd.f32 %v781_v50, %v722_v63 }
 0x175   : > { %v783_v0 = vpop.f32.mrf.mxu2  ;;  %v845_v5 = vpop.f32.mrf.mxu0 }
 0x176   : > { %v875_v8 = vadd.f32 %v845_v5, %v798_v2  ;;  %v858_v9 = vpop.f32.mrf.mxu1 }
 0x177   : > { %v876_v10 = vadd.f32 %v858_v9, %v799_v4 }
 0x178   : > { %v886_v11 = vmul.f32 %v880_v3, %v875_v8 }
 0x179   : > { %v887_v12 = vmul.f32 %v881_v6, %v876_v10 }
 0x17a   : > { %v895_v14 = vmul.f32 %v886_v11, %v886_v11 }
 0x17b   : > { %v896_v16 = vmul.f32 %v887_v12, %v887_v12  ;;  %v889_v18 = vadd.f32 %v887_v12, %v886_v11 }
 0x17d   : > { %v871_v17 = vpop.f32.mrf.mxu2  ;;  %v847_v20 = vpop.f32.mrf.mxu0  ;;  %v898_v21 = vadd.f32 %v896_v16, %v895_v14 }
 0x17e   : > { %v877_v19 = vadd.f32 %v871_v17, %v800_v13  ;;  %v860_v23 = vpop.f32.mrf.mxu1 }
 0x180   : > { %v888_v22 = vmul.f32 %v882_v15, %v877_v19 }
 0x182   : > { %v890_v24 = vadd.f32 %v889_v18, %v888_v22  ;;  %v897_v25 = vmul.f32 %v888_v22, %v888_v22 }
 0x184   : > { %891 = vadd.xlane.f32.xlu2 %v890_v24  ;;  %v899_v26 = vadd.f32 %v898_v21, %v897_v25 }
 0x185   : > { %v873_v27 = vpop.f32.mrf.mxu2 }
 0x186   : > { %900 = vadd.xlane.f32.xlu0 %v899_v26 }
 0x1f7   : > { %v892_v28 = vpop.xlane.xlu2 %891 }
 0x1f8   : > { %894 = vst.msk [vmem:[%s202_s27] sm:$0xff] %vm893_vm10, %v892_v28 }
 0x1f9   : > { %v901_v29 = vpop.xlane.xlu0 %900 }
 0x1fa   : > { %902 = vst.msk [vmem:[%s206_s30] sm:$0xff] %vm893_vm10, %v901_v29 }
 0x1fb PF: > { %s15_s15 = sadd.s32 1, %s1056_s15  }
 0x1fc   : > { %p12_p4 = scmp.ge.s32.totalorder %s15_s15, 4  }
 0x1fe   :  { %14 = sbr.rel (!%p12_p4) target bundleno = 1 (0x1), region = 82 }

// kernel: convolution_block_forward.3
= control target key start
LH: loop header
LB: loop body
LE: loop exit
PB: predicated region body
PF: predicated region fallthrough
CT: control target
= control target key end

     0   :  { %s1062_s15 = smov 0   ;;  %s1205_s0 = inlined_call_operand.vmem [shape: bf16[9,8,4], index: 0, kind: input, shape index: {}]   ;;  %s1206_s1 = inlined_call_operand.vmem [shape: f32[8,1], index: 1, kind: input, shape index: {}]   ;;  %s1207_s2 = inlined_call_operand.vmem [shape: f32[8,1], index: 2, kind: input, shape index: {}]   ;;  %s1208_s3 = inlined_call_operand.vmem [shape: bf16[2,4,456], index: 3, kind: input, shape index: {}]   ;;  %s1209_s4 = inlined_call_operand.vmem [shape: f32[2,8,384], index: 4, kind: output, shape index: {}]  }
   0x1 LB: > { %s954_s16 = sadd.s32 4294967295, %s1026_s15   ;;  %p958_p0 = scmp.ge.s32.totalorder %s1026_s15, 1  ;;  %s1026_s15 = sphi %s1062_s15, %s14_s15  }
   0x2   : > { %p162_p1 = scmp.lt.s32.totalorder %s1026_s15, 3 }
   0x4   : > { %p163_p2 = pnand %p958_p0, %p162_p1 }
   0x5   : > { %p188_p3 = scmp.lt.s32.totalorder (!%p163_p2), %s954_s16, 1  ;;  %s1028_s21 = smov (!%p163_p2), 127  }
   0x6   : > { %166 = sbr.rel (%p163_p2) target bundleno = 392 (0x188), region = 36  ;;  %s1029_s22 = smov (!%p163_p2), 126  }
   0x7   : > { %s1030_s23 = smov (!%p163_p2), 104   ;;  %s1031_s24 = smov (!%p163_p2), 103  }
   0x8   : > { %s1032_s25 = smov (!%p163_p2), 102   ;;  %s1033_s26 = smov (!%p163_p2), 80  }
   0x9   : > { %s1034_s27 = smov (!%p163_p2), 79   ;;  %s1035_s28 = smov (!%p163_p2), 78  }
   0xb   : > { %s1211_s16 = smov (!%p188_p3, %s954_s16), 1  ;;  %vm229_vm0 = vcmask 1041408   ;;  %v200_v37 = vld [vmem:[%s1205_s0] sm:$0xf]  ;;  %vm225_vm1 = vcmask 31744   ;;  %vm349_vm2 = vcmask 1031168  }
   0xc   : > { %s999_s17 = sshll.u32 %s1211_s16, 3  ;;  %vm221_vm3 = vcmask 1039360   ;;  %v962_v54 = vld [vmem:[%s1205_s0 + $0x4] sm:$0xf]  ;;  %vm426_vm4 = vcmask 850944   ;;  %vm503_vm5 = vcmask 842752  }
   0xd   : > { %s192_s20 = scalar_lea.vmem %s1208_s3, %s999_s17  ;;  %v969_v61 = vld [vmem:[%s1205_s0 + $0x8] sm:$0xf]  ;;  %vm580_vm6 = vcmask 834560   ;;  %vm657_vm7 = vcmask 654336   ;;  %vm734_vm8 = vcmask 646144   ;;  %vm811_vm9 = vcmask 637952  }
   0xe   : > { %v1076_v0 = vld [vmem:[%s192_s20] sm:$0xff] }
   0xf   : > { %204 = vst [vmem:[#allocation1] ss:$4 sm:$0xff] %v1076_v0 }
  0x16   : > { %v209_v1 = vld.sshfl [vmem:[#allocation1 + $0x10] sm:$0xff pattern:$0x73625140]  ;;  %v205_v2 = vld.sshfl [vmem:[#allocation1] sm:$0xff pattern:$0x73625140] }
  0x17   : > { %217 = vrot.lane.b32.xlu0 %v209_v1, %s1028_s21  ;;  %213 = vrot.lane.b32.xlu1 %v205_v2, %s1028_s21  ;;  %v211_v3 = vld.sshfl [vmem:[#allocation1 + $0x18] sm:$0xff pattern:$0x73625140]  ;;  %v207_v4 = vld.sshfl [vmem:[#allocation1 + $0x8] sm:$0xff pattern:$0x73625140] }
  0x18   : > { %278 = vst [vmem:[#allocation1] ss:$4 sm:$0xff] %v1076_v0 }
  0x1f   : > { %219 = vrot.lane.b32.xlu0 %v211_v3, %s1028_s21  ;;  %215 = vrot.lane.b32.xlu1 %v207_v4, %s1028_s21  ;;  %v1080_v5 = vld.sshfl [vmem:[#allocation1] sm:$0xff pattern:$0x73625140]  ;;  %v1082_v6 = vld.sshfl [vmem:[#allocation1 + $0x8] sm:$0xff pattern:$0x73625140] }
  0x20   : > { %v1084_v7 = vld.sshfl [vmem:[#allocation1 + $0x10] sm:$0xff pattern:$0x73625140]  ;;  %v285_v34 = vsel %vm229_vm0, %v1080_v5, 0  ;;  %v287_v45 = vsel %vm229_vm0, %v1082_v6, 0 }
  0x21   : > { %332 = vst [vmem:[#allocation1] ss:$4 sm:$0xff] %v1076_v0  ;;  %298 = vmatpush.bf16.msra.mxu3 %v285_v34  ;;  %v289_v49 = vsel %vm229_vm0, %v1084_v7, 0 }
  0x24   : > { %966 = vmatmul.msk.bf16.vlgmr.msra.gmra.mxu3 %vm225_vm1, %v200_v37 }
  0x28   : > { %v335_v8 = vld.sshfl [vmem:[#allocation1 + $0x8] sm:$0xff pattern:$0x73625140]  ;;  %v339_v9 = vld.sshfl [vmem:[#allocation1 + $0x18] sm:$0xff pattern:$0x73625140] }
  0x29   : > { %v337_v10 = vld.sshfl [vmem:[#allocation1 + $0x10] sm:$0xff pattern:$0x73625140]  ;;  %v333_v11 = vld.sshfl [vmem:[#allocation1] sm:$0xff pattern:$0x73625140] }
  0x2a   : > { %345 = vrot.lane.b32.xlu0 %v337_v10, %s1029_s22  ;;  %341 = vrot.lane.b32.xlu2 %v333_v11, %s1029_s22  ;;  %409 = vst [vmem:[#allocation1] ss:$4 sm:$0xff] %v1076_v0  ;;  %v973_v11 = vld [vmem:[%s1205_s0 + $0xc] sm:$0xf] }
  0x31   : > { %v412_v12 = vld.sshfl [vmem:[#allocation1 + $0x8] sm:$0xff pattern:$0x73625140]  ;;  %v414_v13 = vld.sshfl [vmem:[#allocation1 + $0x10] sm:$0xff pattern:$0x73625140] }
  0x32   : > { %v416_v14 = vld.sshfl [vmem:[#allocation1 + $0x18] sm:$0xff pattern:$0x73625140]  ;;  %420 = vrot.lane.b32.xlu1 %v412_v12, %s1030_s23  ;;  %347 = vrot.lane.b32.xlu0 %v339_v9, %s1029_s22  ;;  %v410_v15 = vld.sshfl [vmem:[#allocation1] sm:$0xff pattern:$0x73625140] }
  0x33   : > { %343 = vrot.lane.b32.xlu2 %v335_v8, %s1029_s22  ;;  %486 = vst [vmem:[#allocation1] ss:$4 sm:$0xff] %v1076_v0 }
  0x3a   : > { %418 = vrot.lane.b32.xlu1 %v410_v15, %s1030_s23  ;;  %v491_v16 = vld.sshfl [vmem:[#allocation1 + $0x10] sm:$0xff pattern:$0x73625140]  ;;  %v487_v17 = vld.sshfl [vmem:[#allocation1] sm:$0xff pattern:$0x73625140] }
  0x3b   : > { %499 = vrot.lane.b32.xlu0 %v491_v16, %s1031_s24  ;;  %v493_v18 = vld.sshfl [vmem:[#allocation1 + $0x18] sm:$0xff pattern:$0x73625140]  ;;  %v489_v19 = vld.sshfl [vmem:[#allocation1 + $0x8] sm:$0xff pattern:$0x73625140]  ;;  %422 = vrot.lane.b32.xlu2 %v414_v13, %s1030_s23 }
  0x3c   : > { %563 = vst [vmem:[#allocation1] ss:$4 sm:$0xff] %v1076_v0 }
  0x42   : > { %501 = vrot.lane.b32.xlu1 %v493_v18, %s1031_s24 }
  0x43   : > { %497 = vrot.lane.b32.xlu0 %v489_v19, %s1031_s24  ;;  %v566_v20 = vld.sshfl [vmem:[#allocation1 + $0x8] sm:$0xff pattern:$0x73625140]  ;;  %v568_v21 = vld.sshfl [vmem:[#allocation1 + $0x10] sm:$0xff pattern:$0x73625140]  ;;  %424 = vrot.lane.b32.xlu2 %v416_v14, %s1030_s23 }
  0x44   : > { %v570_v22 = vld.sshfl [vmem:[#allocation1 + $0x18] sm:$0xff pattern:$0x73625140]  ;;  %v564_v23 = vld.sshfl [vmem:[#allocation1] sm:$0xff pattern:$0x73625140] }
  0x45   : > { %640 = vst [vmem:[#allocation1] ss:$4 sm:$0xff] %v1076_v0 }
  0x4a   : > { %572 = vrot.lane.b32.xlu1 %v564_v23, %s1032_s25 }
  0x4b   : > { %495 = vrot.lane.b32.xlu2 %v487_v17, %s1031_s24 }
  0x4c   : > { %v647_v24 = vld.sshfl [vmem:[#allocation1 + $0x18] sm:$0xff pattern:$0x73625140]  ;;  %v641_v25 = vld.sshfl [vmem:[#allocation1] sm:$0xff pattern:$0x73625140] }
  0x4d   : > { %649 = vrot.lane.b32.xlu0 %v641_v25, %s1033_s26  ;;  %v643_v26 = vld.sshfl [vmem:[#allocation1 + $0x8] sm:$0xff pattern:$0x73625140]  ;;  %v645_v27 = vld.sshfl [vmem:[#allocation1 + $0x10] sm:$0xff pattern:$0x73625140] }
  0x4e   : > { %717 = vst [vmem:[#allocation1] ss:$4 sm:$0xff] %v1076_v0 }
  0x52   : > { %651 = vrot.lane.b32.xlu1 %v643_v26, %s1033_s26 }
  0x53   : > { %574 = vrot.lane.b32.xlu2 %v566_v20, %s1032_s25 }
  0x55   : > { %578 = vrot.lane.b32.xlu0 %v570_v22, %s1032_s25  ;;  %v718_v28 = vld.sshfl [vmem:[#allocation1] sm:$0xff pattern:$0x73625140]  ;;  %v720_v29 = vld.sshfl [vmem:[#allocation1 + $0x8] sm:$0xff pattern:$0x73625140] }
  0x56   : > { %v722_v30 = vld.sshfl [vmem:[#allocation1 + $0x10] sm:$0xff pattern:$0x73625140]  ;;  %v724_v31 = vld.sshfl [vmem:[#allocation1 + $0x18] sm:$0xff pattern:$0x73625140] }
  0x57   : > { %794 = vst [vmem:[#allocation1] ss:$4 sm:$0xff] %v1076_v0 }
  0x5a   : > { %653 = vrot.lane.b32.xlu1 %v645_v27, %s1033_s26 }
  0x5b   : > { %576 = vrot.lane.b32.xlu2 %v568_v21, %s1032_s25 }
  0x5d   : > { %730 = vrot.lane.b32.xlu0 %v722_v30, %s1034_s27 }
  0x5e   : > { %v799_v32 = vld.sshfl [vmem:[#allocation1 + $0x10] sm:$0xff pattern:$0x73625140]  ;;  %v795_v33 = vld.sshfl [vmem:[#allocation1] sm:$0xff pattern:$0x73625140] }
  0x5f   : > { %v797_v35 = vld.sshfl [vmem:[#allocation1 + $0x8] sm:$0xff pattern:$0x73625140]  ;;  %v801_v36 = vld.sshfl [vmem:[#allocation1 + $0x18] sm:$0xff pattern:$0x73625140] }
  0x62   : > { %655 = vrot.lane.b32.xlu1 %v647_v24, %s1033_s26 }
  0x63   : > { %728 = vrot.lane.b32.xlu2 %v720_v29, %s1034_s27 }
  0x65   : > { %732 = vrot.lane.b32.xlu0 %v724_v31, %s1034_s27  ;;  %v977_v31 = vld [vmem:[%s1205_s0 + $0x10] sm:$0xf] }
  0x6a   : > { %807 = vrot.lane.b32.xlu1 %v799_v32, %s1035_s28 }
  0x6b   : > { %726 = vrot.lane.b32.xlu2 %v718_v28, %s1034_s27  ;;  %v981_v28 = vld [vmem:[%s1205_s0 + $0x14] sm:$0xf]  ;;  %s1000_s27 = smul.u32 24, %s1211_s16 }
  0x6d   : > { %803 = vrot.lane.b32.xlu0 %v795_v33, %s1035_s28  ;;  %s197_s30 = scalar_lea.vmem %s1209_s4, %s1000_s27 }
  0x72   : > { %805 = vrot.lane.b32.xlu1 %v797_v35, %s1035_s28 }
  0x73   : > { %809 = vrot.lane.b32.xlu2 %v801_v36, %s1035_s28 }
  0x84   : > { %v342_v38 = vpop.permute.xlu2 %341 }
  0x89   : > { %v218_v39 = vpop.permute.xlu0 %217  ;;  %v214_v40 = vpop.permute.xlu1 %213 }
  0x8d   : > { %v344_v41 = vpop.permute.xlu2 %343 }
  0x8e   : > { %v350_v42 = vsel %vm349_vm2, %v342_v38, %v344_v41 }
  0x8f   : > { %v357_v53 = vsel %vm229_vm0, %v350_v42, 0 }
  0x91   : > { %v220_v43 = vpop.permute.xlu0 %219  ;;  %v216_v44 = vpop.permute.xlu1 %215 }
  0x92   : > { %v222_v46 = vsel %vm221_vm3, %v214_v40, %v216_v44  ;;  %v223_v47 = vsel %vm221_vm3, %v216_v44, %v218_v39  ;;  %v224_v48 = vsel %vm221_vm3, %v218_v39, %v220_v43  ;;  %v985_v43 = vld [vmem:[%s1205_s0 + $0x18] sm:$0xf] }
  0x93   : > { %v231_v50 = vsel %vm229_vm0, %v222_v46, 0  ;;  %v234_v51 = vsel %vm229_vm0, %v223_v47, 0  ;;  %v237_v52 = vsel %vm229_vm0, %v224_v48, 0 }
  0x94   : > { %246 = vmatpush.bf16.msra.mxu0 %v231_v50  ;;  %259 = vmatpush.bf16.msra.mxu1 %v234_v51 }
  0x95   : > { %272 = vmatpush.bf16.msra.mxu2 %v237_v52  ;;  %v423_v55 = vpop.permute.xlu2 %422  ;;  %v878_v52 = vld [vmem:[%s1207_s2] sm:$0xff] }
  0x97   : > { %963 = vmatmul.msk.bf16.vlgmr.msra.gmra.mxu0 %vm225_vm1, %v962_v54  ;;  %964 = vmatmul.msk.bf16.vlgmr.msra.gmra.mxu1 %vm225_vm1, %v962_v54 }
  0x98   : > { %311 = vmatpush.bf16.msrb.mxu0 %v287_v45  ;;  %324 = vmatpush.bf16.msrb.mxu1 %v289_v49 }
  0x99   : > { %372 = vmatpush.bf16.msrb.mxu2 %v357_v53 }
  0x9a   : > { %965 = vmatmul.msk.bf16.vlgmr.msra.gmra.mxu2 %vm225_vm1, %v962_v54  ;;  %v1036_v54 = vmov 0  }
  0x9b   : > { %1019 = vset.pattern.permute.xlu0 %v1036_v54  ;;  %1018 = vset.pattern.permute.xlu2 %v1036_v54 }
  0x9c   : > { %v346_v56 = vpop.permute.xlu0 %345  ;;  %881 = vperm.xlu0 %1019, %v878_v52  }
  0x9d   : > { %v351_v57 = vsel %vm349_vm2, %v344_v41, %v346_v56  ;;  %v425_v58 = vpop.permute.xlu2 %424 }
  0x9e   : > { %v360_v59 = vsel %vm229_vm0, %v351_v57, 0  ;;  %v429_v60 = vsel %vm426_vm4, %v423_v55, %v425_v58  ;;  %v989_v58 = vld [vmem:[%s1205_s0 + $0x1c] sm:$0xf] }
  0x9f   : > { %385 = vmatpush.bf16.msrb.mxu3 %v360_v59  ;;  %v440_v62 = vsel %vm229_vm0, %v429_v60, 0 }
  0xa2   : > { %971 = vmatmul.msk.bf16.vlgmr.msrb.gmra.mxu3 %vm225_vm1, %v969_v61 }
  0xa3   : > { %475 = vmatpush.bf16.msra.mxu3 %v440_v62 }
  0xa4   : > { %v421_v63 = vpop.permute.xlu1 %420  ;;  %v348_v0 = vpop.permute.xlu0 %347 }
  0xa5   : > { %v428_v1 = vsel %vm426_vm4, %v421_v63, %v423_v55  ;;  %v352_v2 = vsel %vm349_vm2, %v346_v56, %v348_v0  ;;  %v496_v3 = vpop.permute.xlu2 %495 }
  0xa6   : > { %v437_v4 = vsel %vm229_vm0, %v428_v1, 0  ;;  %v363_v5 = vsel %vm229_vm0, %v352_v2, 0  ;;  %v993_v1 = vld [vmem:[%s1205_s0 + $0x20] sm:$0xf] }
  0xa7   : > { %398 = vmatpush.bf16.msra.mxu0 %v363_v5  ;;  %462 = vmatpush.bf16.msra.mxu2 %v437_v4  ;;  %v300_v2 = vpop.f32.mrf.mxu3 }
  0xa8   : > { %967 = vmatmul.msk.bf16.vlgmr.msrb.gmra.mxu0 %vm225_vm1, %v200_v37  ;;  %968 = vmatmul.msk.bf16.vlgmr.msrb.gmra.mxu1 %vm225_vm1, %v200_v37 }
  0xaa   : > { %970 = vmatmul.msk.bf16.vlgmr.msrb.gmra.mxu2 %vm225_vm1, %v969_v61 }
  0xac   : > { %v419_v6 = vpop.permute.xlu1 %418 }
  0xad   : > { %v427_v7 = vsel %vm426_vm4, %v419_v6, %v421_v63  ;;  %v500_v8 = vpop.permute.xlu0 %499  ;;  %v575_v9 = vpop.permute.xlu2 %574 }
  0xae   : > { %v434_v10 = vsel %vm229_vm0, %v427_v7, 0 }
  0xaf   : > { %449 = vmatpush.bf16.msra.mxu1 %v434_v10  ;;  %v302_v4 = vpop.f32.mrf.mxu3 }
  0xb2   : > { %976 = vmatmul.msk.bf16.vlgmr.msra.gmra.mxu3 %vm225_vm1, %v973_v11 }
  0xb4   : > { %v502_v12 = vpop.permute.xlu1 %501 }
  0xb5   : > { %v506_v13 = vsel %vm503_vm5, %v500_v8, %v502_v12  ;;  %v498_v14 = vpop.permute.xlu0 %497  ;;  %v577_v15 = vpop.permute.xlu2 %576 }
  0xb6   : > { %v517_v16 = vsel %vm229_vm0, %v506_v13, 0  ;;  %v505_v17 = vsel %vm503_vm5, %v498_v14, %v500_v8  ;;  %v504_v18 = vsel %vm503_vm5, %v496_v3, %v498_v14  ;;  %v582_v19 = vsel %vm580_vm6, %v575_v9, %v577_v15  ;;  %v869_v3 = vld [vmem:[%s1206_s1] sm:$0xff] }
  0xb7   : > { %v514_v20 = vsel %vm229_vm0, %v505_v17, 0  ;;  %v511_v21 = vsel %vm229_vm0, %v504_v18, 0  ;;  %552 = vmatpush.bf16.msrb.mxu2 %v517_v16  ;;  %v591_v22 = vsel %vm229_vm0, %v582_v19, 0  ;;  %872 = vperm.xlu2 %1018, %v869_v3  }
  0xb8   : > { %539 = vmatpush.bf16.msrb.mxu1 %v514_v20  ;;  %972 = vmatmul.msk.bf16.vlgmr.msra.gmra.mxu0 %vm225_vm1, %v969_v61 }
  0xb9   : > { %974 = vmatmul.msk.bf16.vlgmr.msra.gmra.mxu1 %vm225_vm1, %v973_v11  ;;  %526 = vmatpush.bf16.msrb.mxu0 %v511_v21 }
  0xba   : > { %975 = vmatmul.msk.bf16.vlgmr.msra.gmra.mxu2 %vm225_vm1, %v973_v11 }
  0xbc   : > { %v573_v23 = vpop.permute.xlu1 %572 }
  0xbd   : > { %616 = vmatpush.bf16.msra.mxu0 %v591_v22  ;;  %v581_v24 = vsel %vm580_vm6, %v573_v23, %v575_v9  ;;  %v729_v25 = vpop.permute.xlu2 %728 }
  0xbe   : > { %v588_v26 = vsel %vm229_vm0, %v581_v24, 0 }
  0xbf   : > { %v650_v27 = vpop.permute.xlu0 %649  ;;  %603 = vmatpush.bf16.msrb.mxu3 %v588_v26 }
  0xc2   : > { %982 = vmatmul.msk.bf16.vlgmr.msrb.gmra.mxu3 %vm225_vm1, %v981_v28 }
  0xc4   : > { %v652_v29 = vpop.permute.xlu1 %651 }
  0xc5   : > { %v658_v30 = vsel %vm657_vm7, %v650_v27, %v652_v29  ;;  %v727_v32 = vpop.permute.xlu2 %726 }
  0xc6   : > { %v665_v33 = vsel %vm229_vm0, %v658_v30, 0  ;;  %v735_v34 = vsel %vm734_vm8, %v727_v32, %v729_v25 }
  0xc7   : > { %v579_v35 = vpop.permute.xlu0 %578  ;;  %680 = vmatpush.bf16.msra.mxu2 %v665_v33  ;;  %v742_v37 = vsel %vm229_vm0, %v735_v34, 0 }
  0xc8   : > { %v583_v36 = vsel %vm580_vm6, %v577_v15, %v579_v35  ;;  %978 = vmatmul.msk.bf16.vlgmr.msrb.gmra.mxu0 %vm225_vm1, %v977_v31 }
  0xc9   : > { %v594_v38 = vsel %vm229_vm0, %v583_v36, 0  ;;  %979 = vmatmul.msk.bf16.vlgmr.msrb.gmra.mxu1 %vm225_vm1, %v977_v31 }
  0xca   : > { %980 = vmatmul.msk.bf16.vlgmr.msrb.gmra.mxu2 %vm225_vm1, %v977_v31  ;;  %629 = vmatpush.bf16.msra.mxu1 %v594_v38 }
  0xcc   : > { %v654_v39 = vpop.permute.xlu1 %653 }
  0xcd   : > { %v659_v40 = vsel %vm657_vm7, %v652_v29, %v654_v39  ;;  %v810_v53 = vpop.permute.xlu2 %809 }
  0xce   : > { %757 = vmatpush.bf16.msrb.mxu1 %v742_v37  ;;  %v668_v41 = vsel %vm229_vm0, %v659_v40, 0 }
  0xcf   : > { %v731_v42 = vpop.permute.xlu0 %730  ;;  %693 = vmatpush.bf16.msra.mxu3 %v668_v41 }
  0xd0   : > { %v736_v44 = vsel %vm734_vm8, %v729_v25, %v731_v42 }
  0xd1   : > { %v745_v45 = vsel %vm229_vm0, %v736_v44, 0 }
  0xd2   : > { %987 = vmatmul.msk.bf16.vlgmr.msra.gmra.mxu3 %vm225_vm1, %v985_v43  ;;  %770 = vmatpush.bf16.msrb.mxu2 %v745_v45 }
  0xd4   : > { %v656_v46 = vpop.permute.xlu1 %655 }
  0xd5   : > { %v660_v47 = vsel %vm657_vm7, %v654_v39, %v656_v46 }
  0xd6   : > { %v671_v48 = vsel %vm229_vm0, %v660_v47, 0 }
  0xd7   : > { %v733_v49 = vpop.permute.xlu0 %732  ;;  %706 = vmatpush.bf16.msrb.mxu0 %v671_v48 }
  0xd8   : > { %v737_v50 = vsel %vm734_vm8, %v731_v42, %v733_v49  ;;  %983 = vmatmul.msk.bf16.vlgmr.msra.gmra.mxu0 %vm225_vm1, %v981_v28 }
  0xd9   : > { %v748_v51 = vsel %vm229_vm0, %v737_v50, 0  ;;  %984 = vmatmul.msk.bf16.vlgmr.msra.gmra.mxu1 %vm225_vm1, %v981_v28 }
  0xda   : > { %986 = vmatmul.msk.bf16.vlgmr.msra.gmra.mxu2 %vm225_vm1, %v985_v43  ;;  %783 = vmatpush.bf16.msrb.mxu3 %v748_v51 }
  0xdc   : > { %v808_v55 = vpop.permute.xlu1 %807 }
  0xdd   : > { %v814_v56 = vsel %vm811_vm9, %v808_v55, %v810_v53 }
  0xde   : > { %v825_v57 = vsel %vm229_vm0, %v814_v56, 0 }
  0xdf   : > { %860 = vmatpush.bf16.msra.mxu2 %v825_v57  ;;  %v804_v59 = vpop.permute.xlu0 %803 }
  0xe2   : > { %992 = vmatmul.msk.bf16.vlgmr.msrb.gmra.mxu3 %vm225_vm1, %v989_v58 }
  0xe4   : > { %v806_v60 = vpop.permute.xlu1 %805 }
  0xe5   : > { %v813_v61 = vsel %vm811_vm9, %v806_v60, %v808_v55  ;;  %v812_v62 = vsel %vm811_vm9, %v804_v59, %v806_v60 }
  0xe6   : > { %v822_v63 = vsel %vm229_vm0, %v813_v61, 0  ;;  %v819_v0 = vsel %vm229_vm0, %v812_v62, 0 }
  0xe7   : > { %847 = vmatpush.bf16.msra.mxu1 %v822_v63  ;;  %834 = vmatpush.bf16.msra.mxu0 %v819_v0 }
  0xe8   : > { %988 = vmatmul.msk.bf16.vlgmr.msrb.gmra.mxu0 %vm225_vm1, %v985_v43 }
  0xe9   : > { %990 = vmatmul.msk.bf16.vlgmr.msrb.gmra.mxu1 %vm225_vm1, %v989_v58 }
  0xea   : > { %991 = vmatmul.msk.bf16.vlgmr.msrb.gmra.mxu2 %vm225_vm1, %v989_v58 }
  0xf8   : > { %994 = vmatmul.msk.bf16.vlgmr.msra.gmra.mxu0 %vm225_vm1, %v993_v1 }
  0xf9   : > { %995 = vmatmul.msk.bf16.vlgmr.msra.gmra.mxu1 %vm225_vm1, %v993_v1 }
  0xfa   : > { %996 = vmatmul.msk.bf16.vlgmr.msra.gmra.mxu2 %vm225_vm1, %v993_v1 }
 0x114   : > { %v248_v5 = vpop.f32.mrf.mxu0  ;;  %v261_v6 = vpop.f32.mrf.mxu1 }
 0x115   : > { %v301_v7 = vadd.f32 %v300_v2, %v248_v5 }
 0x11c   : > { %v250_v9 = vpop.f32.mrf.mxu0  ;;  %v263_v10 = vpop.f32.mrf.mxu1 }
 0x11d   : > { %v274_v8 = vpop.f32.mrf.mxu2 }
 0x125   : > { %v276_v11 = vpop.f32.mrf.mxu2  ;;  %v313_v12 = vpop.f32.mrf.mxu0 }
 0x126   : > { %v326_v13 = vpop.f32.mrf.mxu1  ;;  %v314_v14 = vadd.f32 %v313_v12, %v261_v6  ;;  %v387_v16 = vpop.f32.mrf.mxu3 }
 0x127   : > { %v327_v15 = vadd.f32 %v326_v13, %v274_v8  ;;  %v882_v12 = vpop.permute.xlu0 %881 }
 0x128   : > { %v405_v17 = vadd.f32 %v387_v16, %v314_v14 }
 0x12d   : > { %v374_v18 = vpop.f32.mrf.mxu2  ;;  %v315_v19 = vpop.f32.mrf.mxu0 }
 0x12e   : > { %v328_v20 = vpop.f32.mrf.mxu1  ;;  %v389_v21 = vpop.f32.mrf.mxu3  ;;  %v404_v50 = vadd.f32 %v374_v18, %v301_v7 }
 0x12f   : > { %v873_v7 = vpop.permute.xlu2 %872 }
 0x135   : > { %v376_v22 = vpop.f32.mrf.mxu2  ;;  %v400_v23 = vpop.f32.mrf.mxu0 }
 0x136   : > { %v451_v24 = vpop.f32.mrf.mxu1  ;;  %v477_v25 = vpop.f32.mrf.mxu3  ;;  %v406_v55 = vadd.f32 %v400_v23, %v327_v15 }
 0x137   : > { %v481_v51 = vadd.f32 %v451_v24, %v404_v50 }
 0x138   : > { %v483_v62 = vadd.f32 %v477_v25, %v406_v55 }
 0x13d   : > { %v464_v26 = vpop.f32.mrf.mxu2  ;;  %v402_v27 = vpop.f32.mrf.mxu0 }
 0x13e   : > { %v453_v28 = vpop.f32.mrf.mxu1  ;;  %v479_v29 = vpop.f32.mrf.mxu3  ;;  %v482_v52 = vadd.f32 %v464_v26, %v405_v17 }
 0x145   : > { %v466_v30 = vpop.f32.mrf.mxu2  ;;  %v528_v31 = vpop.f32.mrf.mxu0 }
 0x146   : > { %v541_v32 = vpop.f32.mrf.mxu1  ;;  %v605_v33 = vpop.f32.mrf.mxu3  ;;  %v558_v53 = vadd.f32 %v528_v31, %v481_v51 }
 0x147   : > { %v559_v56 = vadd.f32 %v541_v32, %v482_v52 }
 0x148   : > { %v635_v61 = vadd.f32 %v605_v33, %v558_v53 }
 0x14d   : > { %v554_v34 = vpop.f32.mrf.mxu2  ;;  %v530_v35 = vpop.f32.mrf.mxu0 }
 0x14e   : > { %v543_v36 = vpop.f32.mrf.mxu1  ;;  %v607_v37 = vpop.f32.mrf.mxu3  ;;  %v560_v0 = vadd.f32 %v554_v34, %v483_v62 }
 0x155   : > { %v556_v38 = vpop.f32.mrf.mxu2  ;;  %v618_v39 = vpop.f32.mrf.mxu0 }
 0x156   : > { %v631_v40 = vpop.f32.mrf.mxu1  ;;  %v695_v41 = vpop.f32.mrf.mxu3  ;;  %v636_v60 = vadd.f32 %v618_v39, %v559_v56 }
 0x157   : > { %v637_v4 = vadd.f32 %v631_v40, %v560_v0 }
 0x158   : > { %v713_v1 = vadd.f32 %v695_v41, %v636_v60 }
 0x15d   : > { %v682_v42 = vpop.f32.mrf.mxu2  ;;  %v620_v43 = vpop.f32.mrf.mxu0 }
 0x15e   : > { %v633_v44 = vpop.f32.mrf.mxu1  ;;  %v697_v45 = vpop.f32.mrf.mxu3  ;;  %v712_v63 = vadd.f32 %v682_v42, %v635_v61 }
 0x165   : > { %v684_v46 = vpop.f32.mrf.mxu2  ;;  %v708_v47 = vpop.f32.mrf.mxu0 }
 0x166   : > { %v759_v48 = vpop.f32.mrf.mxu1  ;;  %v785_v49 = vpop.f32.mrf.mxu3  ;;  %v714_v10 = vadd.f32 %v708_v47, %v637_v4 }
 0x167   : > { %v789_v2 = vadd.f32 %v759_v48, %v712_v63 }
 0x168   : > { %v791_v16 = vadd.f32 %v785_v49, %v714_v10 }
 0x16d   : > { %v772_v54 = vpop.f32.mrf.mxu2  ;;  %v710_v57 = vpop.f32.mrf.mxu0 }
 0x16e   : > { %v761_v58 = vpop.f32.mrf.mxu1  ;;  %v787_v59 = vpop.f32.mrf.mxu3  ;;  %v790_v5 = vadd.f32 %v772_v54, %v713_v1 }
 0x175   : > { %v774_v3 = vpop.f32.mrf.mxu2  ;;  %v836_v6 = vpop.f32.mrf.mxu0 }
 0x176   : > { %v866_v8 = vadd.f32 %v836_v6, %v789_v2  ;;  %v849_v9 = vpop.f32.mrf.mxu1 }
 0x177   : > { %v867_v11 = vadd.f32 %v849_v9, %v790_v5 }
 0x178   : > { %v875_v13 = vmul.f32 %v873_v7, %v866_v8 }
 0x179   : > { %v876_v14 = vmul.f32 %v873_v7, %v867_v11 }
 0x17a   : > { %v884_v15 = vadd.f32 %v882_v12, %v875_v13 }
 0x17b   : > { %v885_v17 = vadd.f32 %v882_v12, %v876_v14 }
 0x17c   : > { %vm887_vm10 = vcmp.ge.f32.partialorder %v884_v15, 0.0  ;;  %v890_v18 = vmul.f32 0.2, %v884_v15 }
 0x17d   : > { %v862_v19 = vpop.f32.mrf.mxu2  ;;  %vm888_vm11 = vcmp.ge.f32.partialorder %v885_v17, 0.0  ;;  %v891_v20 = vmul.f32 0.2, %v885_v17  ;;  %v838_v22 = vpop.f32.mrf.mxu0 }
 0x17e   : > { %v868_v21 = vadd.f32 %v862_v19, %v791_v16  ;;  %v893_v23 = vsel %vm887_vm10, %v884_v15, %v890_v18  ;;  %v851_v24 = vpop.f32.mrf.mxu1 }
 0x17f   : > { %v894_v25 = vsel %vm888_vm11, %v885_v17, %v891_v20  ;;  %896 = vst [vmem:[%s197_s30] sm:$0xff] %v893_v23 }
 0x180   : > { %v877_v26 = vmul.f32 %v873_v7, %v868_v21  ;;  %897 = vst [vmem:[%s197_s30 + $0x8] sm:$0xff] %v894_v25 }
 0x182   : > { %v886_v27 = vadd.f32 %v882_v12, %v877_v26 }
 0x184   : > { %vm889_vm12 = vcmp.ge.f32.partialorder %v886_v27, 0.0  ;;  %v892_v28 = vmul.f32 0.2, %v886_v27 }
 0x185   : > { %v864_v29 = vpop.f32.mrf.mxu2 }
 0x186   : > { %v895_v30 = vsel %vm889_vm12, %v886_v27, %v892_v28 }
 0x187   : > { %898 = vst [vmem:[%s197_s30 + $0x10] sm:$0xff] %v895_v30 }
 0x188 PF: > { %s14_s15 = sadd.s32 1, %s1026_s15  }
 0x189   : > { %p11_p4 = scmp.ge.s32.totalorder %s14_s15, 4  }
 0x18b   :  { %13 = sbr.rel (!%p11_p4) target bundleno = 1 (0x1), region = 74 }

</bundles_post_ra>
